<compile_context>
chip_gen: v7x
topology: tpu7x:2x2x1
jax: 0.10.0
libtpu: 0.0.40
codegen_flags: <defaults>
</compile_context>

<pallas_src>
import functools

import numpy as np
import jax
import jax.numpy as jnp
from jax import lax
from jax.experimental import pallas as pl
from jax.experimental.pallas import tpu as pltpu

# ---------------- problem sizes (small, consistent with the module) ----------
B = 8        # batch_size
L = 16       # max_src_seq_len
E = 32       # embed_size
H = 32       # hidden_size (decoder_size)
M = 32       # memory_bank_size (must equal H, see note above)
T = 16       # topic_num
V = 64       # vocab_size
OOV = 4      # max_num_oovs
VEXT = V + OOV
VP = 128     # lane-padded vocab width (>= VEXT, full vreg lane width)

PACKED_ORDER = ["gru_w", "attn_m_w", "attn_d_w", "attn_v", "head_w",
                "v1_w", "v2_w"]


def decoder_kernel(
    # data
    y_emb_ref, topic_ref, h0_ref, mem_ref, tbank_ref, mask_ref, oov_ref,
    # packed weight slabs
    gru_w_ref,      # [E+H+2, 3H] : w_i | w_h | b_i | b_h   (gate order r,z,n)
    attn_m_w_ref,   # [M, 2H]     : wm1 | wm2 (lane-concat)
    attn_d_w_ref,   # [H+T, 2H]   : rows [wd1|wd2 ; wt1|wt2]
    attn_v_ref,     # [2, H]      : v1^T ; v2^T
    head_w_ref,     # [9, 32]     : ps(wc,wct,wt,wh,we) ; pg(wc,wh,we) ; pg_b
    v1_w_ref,       # [M+H+T+1, H]: wc ; wh ; wt ; bias
    v2_w_ref,       # [H+1, VP]   : W (pad cols zero) ; bias (pad cols -1e30)
    # outputs
    final_ref,      # [B, VP]  final_dist (cols >= VEXT are exactly 0)
    aux_ref,        # [B, VP]  [h_next | context | attn1 | p_gen | zero pad]
):
  f32 = jnp.float32
  dot = functools.partial(jnp.dot, preferred_element_type=jnp.float32)

  x = y_emb_ref[...]        # [B, E]
  h = h0_ref[...]           # [B, H]
  topic = topic_ref[...]    # [B, T]
  mask = mask_ref[...]      # [B, L]

  # ---------------- GRU cell (fused gates: 2 matmuls) -------------------------
  gru_w = gru_w_ref[...]                                   # [E+H+2, 3H]
  xw = dot(x, gru_w[:E]) + gru_w[E + H:E + H + 1]          # [B, 3H]
  hw = dot(h, gru_w[E:E + H]) + gru_w[E + H + 1:E + H + 2] # [B, 3H]
  r = jax.nn.sigmoid(xw[:, :H] + hw[:, :H])
  z = jax.nn.sigmoid(xw[:, H:2 * H] + hw[:, H:2 * H])
  n = jnp.tanh(xw[:, 2 * H:] + r * hw[:, 2 * H:])
  h_next = (1.0 - z) * n + z * h                           # [B, H]

  # ---------------- TopicAttention ("concat" / Bahdanau), both layers ---------
  # one shared decoder/topic projection matmul for both attention layers
  dq = jnp.concatenate([h_next, topic], axis=1)            # [B, H+T]
  dproj = dot(dq, attn_d_w_ref[...])                       # [B, 2H]
  attn_m_w = attn_m_w_ref[...]                             # [M, 2H]
  attn_v = attn_v_ref[...]                                 # [2, H]

  def topic_attention(bank_flat, wm, d, v_row):
    # bank_flat: [B*L, M] — one 128-row matmul covers the whole bank.
    pm = dot(bank_flat, wm)                                # [B*L, H]
    e = jnp.tanh(pm.reshape(B, L, H) + d[:, None, :])      # [B, L, H]
    # score projection as elementwise mul + lane reduce (avoid N=1 matmul)
    scores = jnp.sum(e * v_row[None, :, :], axis=-1)       # [B, L]
    s = jnp.where(mask > 0, scores, jnp.float32(-1e30))
    s = s - jnp.max(s, axis=1, keepdims=True)
    ex = jnp.exp(s) * mask
    denom = jnp.maximum(jnp.sum(ex, axis=1, keepdims=True), jnp.float32(1e-20))
    attn = ex / denom                                      # [B, L]
    # vectorized weighted sum over source positions (sublane reduce)
    ctx = jnp.sum(attn[:, :, None] * bank_flat.reshape(B, L, M), axis=1)
    return ctx, attn                                       # [B, M], [B, L]

  ctx1, attn1 = topic_attention(mem_ref[...], attn_m_w[:, :H],
                                dproj[:, :H], attn_v[0:1])
  ctx2, _ = topic_attention(tbank_ref[...], attn_m_w[:, H:],
                            dproj[:, H:], attn_v[1:2])

  # ---------------- scalar heads as lane reductions (no N=1 matmuls) ----------
  head_w = head_w_ref[...]                                 # [9, 32]

  def rowdot(a, w_row):
    return jnp.sum(a * w_row, axis=-1, keepdims=True)      # [B, 1]

  # soft context gate (bias-free linear over [ctx1|ctx2|topic|h|y_emb])
  ps_logit = (rowdot(ctx1, head_w[0:1, :M]) + rowdot(ctx2, head_w[1:2, :M]) +
              rowdot(topic, head_w[2:3, :T]) + rowdot(h_next, head_w[3:4, :H]) +
              rowdot(x, head_w[4:5, :E]))
  p_soft = jax.nn.sigmoid(ps_logit)
  context = p_soft * ctx1 + (1.0 - p_soft) * ctx2          # [B, M]

  # ---------------- vocab distribution (lane-dense, VP = 128) -----------------
  v1_w = v1_w_ref[...]                                     # [M+H+T+1, H]
  vocab_in = jnp.concatenate([context, h_next, topic], axis=1)   # [B, M+H+T]
  vl1 = dot(vocab_in, v1_w[:M + H + T]) + v1_w[M + H + T:M + H + T + 1]
  v2_w = v2_w_ref[...]                                     # [H+1, VP]
  logits = dot(vl1, v2_w[:H]) + v2_w[H:H + 1]              # [B, VP]
  logits = logits - jnp.max(logits, axis=1, keepdims=True)
  expz = jnp.exp(logits)
  vocab_dist = expz / jnp.sum(expz, axis=1, keepdims=True) # exact 0 on pad cols

  # ---------------- pointer-generator copy mechanism --------------------------
  pg_logit = (rowdot(context, head_w[5:6, :M]) + rowdot(h_next, head_w[6:7, :H]) +
              rowdot(x, head_w[7:8, :E]) + head_w[8:9, 0:1])
  p_gen = jax.nn.sigmoid(pg_logit)                         # [B, 1]

  attn_c = (1.0 - p_gen) * attn1                           # [B, L]
  # vectorized scatter_add(final, src_oov, attn_c): one-hot compare + reduce
  iota_v = lax.broadcasted_iota(jnp.int32, (B, L, VP), 2)
  so3 = oov_ref[...][:, :, None]                           # [B, L, 1] int32
  copy_add = jnp.sum(jnp.where(iota_v == so3, attn_c[:, :, None], 0.0), axis=1)
  final_ref[...] = p_gen * vocab_dist + copy_add           # [B, VP]

  # packed auxiliary outputs (single lane-dense store)
  pad = jnp.zeros((B, VP - (H + M + L + 1)), f32)
  aux_ref[...] = jnp.concatenate([h_next, context, attn1, p_gen, pad], axis=1)


def rnn_decoder_tw_forward(packed, y, topic_represent, h, memory_bank,
                           hidden_topic_bank, src_mask, max_num_oovs, src_oov):
  """JAX glue around the fused Pallas kernel. Mirrors RNNDecoderTW.forward."""
  assert max_num_oovs == OOV
  y_emb = packed["embedding"][y]                 # [B, E] (embedding gather)
  h0 = h[0]                                      # num_layers == 1
  mem_flat = memory_bank.reshape(B * L, M)       # free reshape (no transpose)
  tbank_flat = hidden_topic_bank.reshape(B * L, M)

  inputs = [
      y_emb.astype(jnp.float32),
      topic_represent.astype(jnp.float32),
      h0.astype(jnp.float32),
      mem_flat.astype(jnp.float32),
      tbank_flat.astype(jnp.float32),
      src_mask.astype(jnp.float32),
      src_oov.astype(jnp.int32),
  ] + [packed[name] for name in PACKED_ORDER]

  out_shape = (
      jax.ShapeDtypeStruct((B, VP), jnp.float32),   # padded final_dist
      jax.ShapeDtypeStruct((B, VP), jnp.float32),   # packed aux outputs
  )
  vmem = pl.BlockSpec(memory_space=pltpu.MemorySpace.VMEM)
  final_pad, aux = pl.pallas_call(
      decoder_kernel,
      out_shape=out_shape,
      in_specs=[vmem] * len(inputs),
      out_specs=[vmem, vmem],
  )(*inputs)

  final_dist = final_pad[:, :VEXT]                         # [B, V+OOV]
  h_next = aux[:, :H][None, :, :]                          # [1, B, H]
  context = aux[:, H:H + M]                                # [B, M]
  attn_dist = aux[:, H + M:H + M + L]                      # [B, L]
  p_gen = aux[:, H + M + L:H + M + L + 1]                  # [B, 1]
  coverage = None                                          # coverage_attn=False
  return final_dist, h_next, context, attn_dist, p_gen, coverage


def init_params(key):
  """PyTorch-equivalent parameters, pre-transposed to [in, out]."""
  keys = jax.random.split(key, 64)
  it = iter(range(64))

  def mat(shape, scale=0.08):
    return (scale * jax.random.normal(keys[next(it)], shape)).astype(jnp.float32)

  p = {}
  p["embedding"] = mat((V, E), 0.1)
  for name in ["w_ir", "w_iz", "w_in"]:
    p[name] = mat((E, H))
  for name in ["w_hr", "w_hz", "w_hn"]:
    p[name] = mat((H, H))
  for name in ["b_ir", "b_iz", "b_in", "b_hr", "b_hz", "b_hn"]:
    p[name] = mat((1, H))
  for pref in ["a1", "a2"]:
    p[pref + "_wm"] = mat((M, H))
    p[pref + "_wd"] = mat((H, H))
    p[pref + "_wt"] = mat((T, H))
    p[pref + "_v"] = mat((H, 1))
  p["ps_wc"] = mat((M, 1)); p["ps_wct"] = mat((M, 1)); p["ps_wt"] = mat((T, 1))
  p["ps_wh"] = mat((H, 1)); p["ps_we"] = mat((E, 1))
  p["v1_wc"] = mat((M, H)); p["v1_wh"] = mat((H, H)); p["v1_wt"] = mat((T, H))
  p["v1_b"] = mat((1, H))
  p["v2_w"] = mat((H, V)); p["v2_b"] = mat((1, V))
  p["pg_wc"] = mat((M, 1)); p["pg_wh"] = mat((H, 1)); p["pg_we"] = mat((E, 1))
  p["pg_b"] = mat((1, 1))
  return p


def pack_params(p):
  """Host-side (one-time) packing into per-stage weight slabs."""
  f32 = jnp.float32

  def row32(w):                       # [K, 1] -> [1, 32] zero-padded row
    r = jnp.transpose(w)
    return jnp.pad(r, ((0, 0), (0, 32 - r.shape[1])))

  packed = {
      "embedding": p["embedding"],
      # GRU: [E+H+2, 3H] = w_i ; w_h ; b_i ; b_h (gate order r, z, n)
      "gru_w": jnp.concatenate([
          jnp.concatenate([p["w_ir"], p["w_iz"], p["w_in"]], axis=1),
          jnp.concatenate([p["w_hr"], p["w_hz"], p["w_hn"]], axis=1),
          jnp.concatenate([p["b_ir"], p["b_iz"], p["b_in"]], axis=1),
          jnp.concatenate([p["b_hr"], p["b_hz"], p["b_hn"]], axis=1)], axis=0),
      # attention memory projections, lane-concatenated
      "attn_m_w": jnp.concatenate([p["a1_wm"], p["a2_wm"]], axis=1),
      # shared decoder/topic projection: rows [wd1|wd2 ; wt1|wt2]
      "attn_d_w": jnp.concatenate([
          jnp.concatenate([p["a1_wd"], p["a2_wd"]], axis=1),
          jnp.concatenate([p["a1_wt"], p["a2_wt"]], axis=1)], axis=0),
      "attn_v": jnp.concatenate([jnp.transpose(p["a1_v"]),
                                 jnp.transpose(p["a2_v"])], axis=0),
      # scalar heads (p_soft gate + p_gen) as rows of a [9, 32] slab
      "head_w": jnp.concatenate([
          row32(p["ps_wc"]), row32(p["ps_wct"]), row32(p["ps_wt"]),
          row32(p["ps_wh"]), row32(p["ps_we"]),
          row32(p["pg_wc"]), row32(p["pg_wh"]), row32(p["pg_we"]),
          row32(p["pg_b"])], axis=0),
      # vocab_dist_linear_1: [M+H+T+1, H] = wc ; wh ; wt ; bias
      "v1_w": jnp.concatenate([p["v1_wc"], p["v1_wh"], p["v1_wt"], p["v1_b"]],
                              axis=0),
      # vocab_dist_linear_2 padded to VP lanes (zero weights, -1e30 bias on the
      # OOV + alignment padding columns so the softmax puts exact zeros there)
      "v2_w": jnp.concatenate([
          jnp.concatenate([p["v2_w"], jnp.zeros((H, VP - V), f32)], axis=1),
          jnp.concatenate([p["v2_b"], jnp.full((1, VP - V), -1e30, f32)],
                          axis=1)], axis=0),
  }
  return packed


if __name__ == "__main__":
  key = jax.random.PRNGKey(0)
  kp, kd = jax.random.split(key)
  params = init_params(kp)
  packed = pack_params(params)
  packed = jax.tree_util.tree_map(jax.block_until_ready, packed)  # one-time pack

  dk = jax.random.split(kd, 8)
  y = jax.random.randint(dk[0], (B,), 0, V)
  topic_represent = jax.nn.softmax(jax.random.normal(dk[1], (B, T)), axis=-1)
  h = 0.1 * jax.random.normal(dk[2], (1, B, H), dtype=jnp.float32)
  memory_bank = 0.1 * jax.random.normal(dk[3], (B, L, M), dtype=jnp.float32)
  hidden_topic_bank = 0.1 * jax.random.normal(dk[4], (B, L, M),
                                              dtype=jnp.float32)
  lengths = jnp.array([L, L - 2, L - 5, 6, L, 10, 3, L], dtype=jnp.int32)
  src_mask = (jnp.arange(L)[None, :] < lengths[:, None]).astype(jnp.float32)
  src_oov = jax.random.randint(dk[5], (B, L), 0, V + OOV)

  outs = rnn_decoder_tw_forward(packed, y, topic_represent, h, memory_bank,
                                hidden_topic_bank, src_mask, OOV, src_oov)
  final_dist, h_next, context, attn_dist, p_gen, coverage = outs
  jax.block_until_ready(final_dist)

  # sanity: pointer-generator output is a proper distribution over V + OOV
  row_sums = np.asarray(jnp.sum(final_dist, axis=1))
  attn_sums = np.asarray(jnp.sum(attn_dist, axis=1))
  assert final_dist.shape == (B, V + OOV)
  assert h_next.shape == (1, B, H)
  assert context.shape == (B, M)
  assert attn_dist.shape == (B, L)
  assert p_gen.shape == (B, 1)
  assert np.allclose(row_sums, 1.0, atol=1e-3), row_sums
  assert np.allclose(attn_sums, 1.0, atol=1e-3), attn_sums
  assert np.all(np.isfinite(np.asarray(final_dist)))
  assert np.all(np.isfinite(np.asarray(context)))
  print("KERNEL_OK")
</pallas_src>

<mosaic_0001>
module attributes {stable_mosaic.version = 11 : i64} {
  func.func @decoder_kernel(%arg0: memref<8x32xf32, #tpu.memory_space<vmem>>, %arg1: memref<8x16xf32, #tpu.memory_space<vmem>>, %arg2: memref<8x32xf32, #tpu.memory_space<vmem>>, %arg3: memref<128x32xf32, #tpu.memory_space<vmem>>, %arg4: memref<128x32xf32, #tpu.memory_space<vmem>>, %arg5: memref<8x16xf32, #tpu.memory_space<vmem>>, %arg6: memref<8x16xi32, #tpu.memory_space<vmem>>, %arg7: memref<66x96xf32, #tpu.memory_space<vmem>>, %arg8: memref<32x64xf32, #tpu.memory_space<vmem>>, %arg9: memref<48x64xf32, #tpu.memory_space<vmem>>, %arg10: memref<2x32xf32, #tpu.memory_space<vmem>>, %arg11: memref<9x32xf32, #tpu.memory_space<vmem>>, %arg12: memref<81x32xf32, #tpu.memory_space<vmem>>, %arg13: memref<33x128xf32, #tpu.memory_space<vmem>>, %arg14: memref<8x128xf32, #tpu.memory_space<vmem>>, %arg15: memref<8x128xf32, #tpu.memory_space<vmem>>) attributes {dimension_semantics = [], scalar_prefetch = 0 : i64, scratch_operands = 0 : i64, tpu.core_type = #tpu.core_type<tc>} {
    %c0 = arith.constant 0 : index
    %c0_0 = arith.constant 0 : index
    %0 = vector.load %arg0[%c0, %c0_0] : memref<8x32xf32, #tpu.memory_space<vmem>>, vector<8x32xf32>
    %c0_1 = arith.constant 0 : index
    %c0_2 = arith.constant 0 : index
    %1 = vector.load %arg2[%c0_1, %c0_2] : memref<8x32xf32, #tpu.memory_space<vmem>>, vector<8x32xf32>
    %c0_3 = arith.constant 0 : index
    %c0_4 = arith.constant 0 : index
    %2 = vector.load %arg1[%c0_3, %c0_4] : memref<8x16xf32, #tpu.memory_space<vmem>>, vector<8x16xf32>
    %c0_5 = arith.constant 0 : index
    %c0_6 = arith.constant 0 : index
    %3 = vector.load %arg5[%c0_5, %c0_6] : memref<8x16xf32, #tpu.memory_space<vmem>>, vector<8x16xf32>
    %c0_7 = arith.constant 0 : index
    %c0_8 = arith.constant 0 : index
    %4 = vector.load %arg7[%c0_7, %c0_8] : memref<66x96xf32, #tpu.memory_space<vmem>>, vector<66x96xf32>
    %5 = vector.extract_strided_slice %4 {offsets = [0, 0], sizes = [32, 96], strides = [1, 1]} : vector<66x96xf32> to vector<32x96xf32>
    %cst = arith.constant dense<0.000000e+00> : vector<8x96xf32>
    %6 = tpu.matmul %0, %5, %cst {dimension_numbers = #tpu.dot_dimension_numbers<[1], [0], [0], [1], [0, 0, 1, 1], [], []>} : vector<8x32xf32>, vector<32x96xf32>, vector<8x96xf32> -> vector<8x96xf32>
    %7 = vector.extract_strided_slice %4 {offsets = [64, 0], sizes = [1, 96], strides = [1, 1]} : vector<66x96xf32> to vector<1x96xf32>
    %8 = vector.broadcast %7 : vector<1x96xf32> to vector<8x96xf32>
    %9 = arith.addf %6, %8 : vector<8x96xf32>
    %10 = vector.extract_strided_slice %4 {offsets = [32, 0], sizes = [32, 96], strides = [1, 1]} : vector<66x96xf32> to vector<32x96xf32>
    %cst_9 = arith.constant dense<0.000000e+00> : vector<8x96xf32>
    %11 = tpu.matmul %1, %10, %cst_9 {dimension_numbers = #tpu.dot_dimension_numbers<[1], [0], [0], [1], [0, 0, 1, 1], [], []>} : vector<8x32xf32>, vector<32x96xf32>, vector<8x96xf32> -> vector<8x96xf32>
    %12 = vector.extract_strided_slice %4 {offsets = [65, 0], sizes = [1, 96], strides = [1, 1]} : vector<66x96xf32> to vector<1x96xf32>
    %13 = vector.broadcast %12 : vector<1x96xf32> to vector<8x96xf32>
    %14 = arith.addf %11, %13 : vector<8x96xf32>
    %15 = vector.extract_strided_slice %9 {offsets = [0, 0], sizes = [8, 32], strides = [1, 1]} : vector<8x96xf32> to vector<8x32xf32>
    %16 = vector.extract_strided_slice %14 {offsets = [0, 0], sizes = [8, 32], strides = [1, 1]} : vector<8x96xf32> to vector<8x32xf32>
    %17 = arith.addf %15, %16 : vector<8x32xf32>
    %18 = arith.negf %17 : vector<8x32xf32>
    %19 = math.exp %18 : vector<8x32xf32>
    %cst_10 = arith.constant 1.000000e+00 : f32
    %20 = vector.broadcast %cst_10 : f32 to vector<8x32xf32>
    %21 = arith.addf %20, %19 : vector<8x32xf32>
    %22 = arith.divf %20, %21 : vector<8x32xf32>
    %23 = vector.extract_strided_slice %9 {offsets = [0, 32], sizes = [8, 32], strides = [1, 1]} : vector<8x96xf32> to vector<8x32xf32>
    %24 = vector.extract_strided_slice %14 {offsets = [0, 32], sizes = [8, 32], strides = [1, 1]} : vector<8x96xf32> to vector<8x32xf32>
    %25 = arith.addf %23, %24 : vector<8x32xf32>
    %26 = arith.negf %25 : vector<8x32xf32>
    %27 = math.exp %26 : vector<8x32xf32>
    %cst_11 = arith.constant 1.000000e+00 : f32
    %28 = vector.broadcast %cst_11 : f32 to vector<8x32xf32>
    %29 = arith.addf %28, %27 : vector<8x32xf32>
    %30 = arith.divf %28, %29 : vector<8x32xf32>
    %31 = vector.extract_strided_slice %9 {offsets = [0, 64], sizes = [8, 32], strides = [1, 1]} : vector<8x96xf32> to vector<8x32xf32>
    %32 = vector.extract_strided_slice %14 {offsets = [0, 64], sizes = [8, 32], strides = [1, 1]} : vector<8x96xf32> to vector<8x32xf32>
    %33 = arith.mulf %22, %32 : vector<8x32xf32>
    %34 = arith.addf %31, %33 : vector<8x32xf32>
    %35 = math.tanh %34 : vector<8x32xf32>
    %cst_12 = arith.constant 1.000000e+00 : f32
    %36 = vector.broadcast %cst_12 : f32 to vector<8x32xf32>
    %37 = arith.subf %36, %30 : vector<8x32xf32>
    %38 = arith.mulf %37, %35 : vector<8x32xf32>
    %39 = arith.mulf %30, %1 : vector<8x32xf32>
    %40 = arith.addf %38, %39 : vector<8x32xf32>
    %41 = tpu.concatenate %40, %2 in 1 : vector<8x32xf32>, vector<8x16xf32> -> vector<8x48xf32>
    %c0_13 = arith.constant 0 : index
    %c0_14 = arith.constant 0 : index
    %42 = vector.load %arg9[%c0_13, %c0_14] : memref<48x64xf32, #tpu.memory_space<vmem>>, vector<48x64xf32>
    %cst_15 = arith.constant dense<0.000000e+00> : vector<8x64xf32>
    %43 = tpu.matmul %41, %42, %cst_15 {dimension_numbers = #tpu.dot_dimension_numbers<[1], [0], [0], [1], [0, 0, 1, 1], [], []>} : vector<8x48xf32>, vector<48x64xf32>, vector<8x64xf32> -> vector<8x64xf32>
    %c0_16 = arith.constant 0 : index
    %c0_17 = arith.constant 0 : index
    %44 = vector.load %arg8[%c0_16, %c0_17] : memref<32x64xf32, #tpu.memory_space<vmem>>, vector<32x64xf32>
    %c0_18 = arith.constant 0 : index
    %c0_19 = arith.constant 0 : index
    %45 = vector.load %arg10[%c0_18, %c0_19] : memref<2x32xf32, #tpu.memory_space<vmem>>, vector<2x32xf32>
    %c0_20 = arith.constant 0 : index
    %c0_21 = arith.constant 0 : index
    %46 = vector.load %arg3[%c0_20, %c0_21] : memref<128x32xf32, #tpu.memory_space<vmem>>, vector<128x32xf32>
    %47 = vector.extract_strided_slice %44 {offsets = [0, 0], sizes = [32, 32], strides = [1, 1]} : vector<32x64xf32> to vector<32x32xf32>
    %48 = vector.extract_strided_slice %43 {offsets = [0, 0], sizes = [8, 32], strides = [1, 1]} : vector<8x64xf32> to vector<8x32xf32>
    %49 = vector.extract_strided_slice %45 {offsets = [0, 0], sizes = [1, 32], strides = [1, 1]} : vector<2x32xf32> to vector<1x32xf32>
    %cst_22 = arith.constant dense<0.000000e+00> : vector<128x32xf32>
    %50 = tpu.matmul %46, %47, %cst_22 {dimension_numbers = #tpu.dot_dimension_numbers<[1], [0], [0], [1], [0, 0, 1, 1], [], []>} : vector<128x32xf32>, vector<32x32xf32>, vector<128x32xf32> -> vector<128x32xf32>
    %51 = vector.shape_cast %50 : vector<128x32xf32> to vector<8x16x32xf32>
    %52 = vector.shape_cast %48 : vector<8x32xf32> to vector<8x1x32xf32>
    %53 = vector.broadcast %52 : vector<8x1x32xf32> to vector<8x16x32xf32>
    %54 = arith.addf %51, %53 : vector<8x16x32xf32>
    %55 = math.tanh %54 : vector<8x16x32xf32>
    %56 = vector.shape_cast %49 : vector<1x32xf32> to vector<1x1x32xf32>
    %57 = vector.broadcast %56 : vector<1x1x32xf32> to vector<8x16x32xf32>
    %58 = arith.mulf %55, %57 : vector<8x16x32xf32>
    %cst_23 = arith.constant dense<0.000000e+00> : vector<8x16xf32>
    %59 = vector.multi_reduction <add>, %58, %cst_23 [2] : vector<8x16x32xf32> to vector<8x16xf32>
    %cst_24 = arith.constant 0.000000e+00 : f32
    %60 = vector.broadcast %cst_24 : f32 to vector<8x16xf32>
    %61 = arith.cmpf ogt, %3, %60 : vector<8x16xf32>
    %cst_25 = arith.constant -1.000000e+30 : f32
    %62 = vector.broadcast %cst_25 : f32 to vector<8x16xf32>
    %63 = arith.select %61, %59, %62 : vector<8x16xi1>, vector<8x16xf32>
    %cst_26 = arith.constant dense<0xFF800000> : vector<8xf32>
    %64 = vector.multi_reduction <maximumf>, %63, %cst_26 [1] : vector<8x16xf32> to vector<8xf32>
    %65 = vector.shape_cast %64 : vector<8xf32> to vector<8x1xf32>
    %66 = vector.broadcast %65 : vector<8x1xf32> to vector<8x16xf32>
    %67 = arith.subf %63, %66 : vector<8x16xf32>
    %68 = math.exp %67 : vector<8x16xf32>
    %69 = arith.mulf %68, %3 : vector<8x16xf32>
    %cst_27 = arith.constant dense<0.000000e+00> : vector<8xf32>
    %70 = vector.multi_reduction <add>, %69, %cst_27 [1] : vector<8x16xf32> to vector<8xf32>
    %71 = vector.shape_cast %70 : vector<8xf32> to vector<8x1xf32>
    %cst_28 = arith.constant 9.99999968E-21 : f32
    %72 = vector.broadcast %cst_28 : f32 to vector<8x1xf32>
    %73 = arith.maximumf %71, %72 : vector<8x1xf32>
    %74 = vector.broadcast %73 : vector<8x1xf32> to vector<8x16xf32>
    %75 = arith.divf %69, %74 : vector<8x16xf32>
    %76 = vector.shape_cast %75 : vector<8x16xf32> to vector<8x16x1xf32>
    %77 = vector.shape_cast %46 : vector<128x32xf32> to vector<8x16x32xf32>
    %78 = vector.broadcast %76 : vector<8x16x1xf32> to vector<8x16x32xf32>
    %79 = arith.mulf %78, %77 : vector<8x16x32xf32>
    %cst_29 = arith.constant dense<0.000000e+00> : vector<8x32xf32>
    %80 = vector.multi_reduction <add>, %79, %cst_29 [1] : vector<8x16x32xf32> to vector<8x32xf32>
    %c0_30 = arith.constant 0 : index
    %c0_31 = arith.constant 0 : index
    %81 = vector.load %arg4[%c0_30, %c0_31] : memref<128x32xf32, #tpu.memory_space<vmem>>, vector<128x32xf32>
    %82 = vector.extract_strided_slice %44 {offsets = [0, 32], sizes = [32, 32], strides = [1, 1]} : vector<32x64xf32> to vector<32x32xf32>
    %83 = vector.extract_strided_slice %43 {offsets = [0, 32], sizes = [8, 32], strides = [1, 1]} : vector<8x64xf32> to vector<8x32xf32>
    %84 = vector.extract_strided_slice %45 {offsets = [1, 0], sizes = [1, 32], strides = [1, 1]} : vector<2x32xf32> to vector<1x32xf32>
    %cst_32 = arith.constant dense<0.000000e+00> : vector<128x32xf32>
    %85 = tpu.matmul %81, %82, %cst_32 {dimension_numbers = #tpu.dot_dimension_numbers<[1], [0], [0], [1], [0, 0, 1, 1], [], []>} : vector<128x32xf32>, vector<32x32xf32>, vector<128x32xf32> -> vector<128x32xf32>
    %86 = vector.shape_cast %85 : vector<128x32xf32> to vector<8x16x32xf32>
    %87 = vector.shape_cast %83 : vector<8x32xf32> to vector<8x1x32xf32>
    %88 = vector.broadcast %87 : vector<8x1x32xf32> to vector<8x16x32xf32>
    %89 = arith.addf %86, %88 : vector<8x16x32xf32>
    %90 = math.tanh %89 : vector<8x16x32xf32>
    %91 = vector.shape_cast %84 : vector<1x32xf32> to vector<1x1x32xf32>
    %92 = vector.broadcast %91 : vector<1x1x32xf32> to vector<8x16x32xf32>
    %93 = arith.mulf %90, %92 : vector<8x16x32xf32>
    %cst_33 = arith.constant dense<0.000000e+00> : vector<8x16xf32>
    %94 = vector.multi_reduction <add>, %93, %cst_33 [2] : vector<8x16x32xf32> to vector<8x16xf32>
    %cst_34 = arith.constant 0.000000e+00 : f32
    %95 = vector.broadcast %cst_34 : f32 to vector<8x16xf32>
    %96 = arith.cmpf ogt, %3, %95 : vector<8x16xf32>
    %cst_35 = arith.constant -1.000000e+30 : f32
    %97 = vector.broadcast %cst_35 : f32 to vector<8x16xf32>
    %98 = arith.select %96, %94, %97 : vector<8x16xi1>, vector<8x16xf32>
    %cst_36 = arith.constant dense<0xFF800000> : vector<8xf32>
    %99 = vector.multi_reduction <maximumf>, %98, %cst_36 [1] : vector<8x16xf32> to vector<8xf32>
    %100 = vector.shape_cast %99 : vector<8xf32> to vector<8x1xf32>
    %101 = vector.broadcast %100 : vector<8x1xf32> to vector<8x16xf32>
    %102 = arith.subf %98, %101 : vector<8x16xf32>
    %103 = math.exp %102 : vector<8x16xf32>
    %104 = arith.mulf %103, %3 : vector<8x16xf32>
    %cst_37 = arith.constant dense<0.000000e+00> : vector<8xf32>
    %105 = vector.multi_reduction <add>, %104, %cst_37 [1] : vector<8x16xf32> to vector<8xf32>
    %106 = vector.shape_cast %105 : vector<8xf32> to vector<8x1xf32>
    %cst_38 = arith.constant 9.99999968E-21 : f32
    %107 = vector.broadcast %cst_38 : f32 to vector<8x1xf32>
    %108 = arith.maximumf %106, %107 : vector<8x1xf32>
    %109 = vector.broadcast %108 : vector<8x1xf32> to vector<8x16xf32>
    %110 = arith.divf %104, %109 : vector<8x16xf32>
    %111 = vector.shape_cast %110 : vector<8x16xf32> to vector<8x16x1xf32>
    %112 = vector.shape_cast %81 : vector<128x32xf32> to vector<8x16x32xf32>
    %113 = vector.broadcast %111 : vector<8x16x1xf32> to vector<8x16x32xf32>
    %114 = arith.mulf %113, %112 : vector<8x16x32xf32>
    %cst_39 = arith.constant dense<0.000000e+00> : vector<8x32xf32>
    %115 = vector.multi_reduction <add>, %114, %cst_39 [1] : vector<8x16x32xf32> to vector<8x32xf32>
    %c0_40 = arith.constant 0 : index
    %c0_41 = arith.constant 0 : index
    %116 = vector.load %arg11[%c0_40, %c0_41] : memref<9x32xf32, #tpu.memory_space<vmem>>, vector<9x32xf32>
    %117 = vector.extract_strided_slice %116 {offsets = [0, 0], sizes = [1, 32], strides = [1, 1]} : vector<9x32xf32> to vector<1x32xf32>
    %118 = vector.broadcast %117 : vector<1x32xf32> to vector<8x32xf32>
    %119 = arith.mulf %80, %118 : vector<8x32xf32>
    %cst_42 = arith.constant dense<0.000000e+00> : vector<8xf32>
    %120 = vector.multi_reduction <add>, %119, %cst_42 [1] : vector<8x32xf32> to vector<8xf32>
    %121 = vector.shape_cast %120 : vector<8xf32> to vector<8x1xf32>
    %122 = vector.extract_strided_slice %116 {offsets = [1, 0], sizes = [1, 32], strides = [1, 1]} : vector<9x32xf32> to vector<1x32xf32>
    %123 = vector.broadcast %122 : vector<1x32xf32> to vector<8x32xf32>
    %124 = arith.mulf %115, %123 : vector<8x32xf32>
    %cst_43 = arith.constant dense<0.000000e+00> : vector<8xf32>
    %125 = vector.multi_reduction <add>, %124, %cst_43 [1] : vector<8x32xf32> to vector<8xf32>
    %126 = vector.shape_cast %125 : vector<8xf32> to vector<8x1xf32>
    %127 = arith.addf %121, %126 : vector<8x1xf32>
    %128 = vector.extract_strided_slice %116 {offsets = [2, 0], sizes = [1, 16], strides = [1, 1]} : vector<9x32xf32> to vector<1x16xf32>
    %129 = vector.broadcast %128 : vector<1x16xf32> to vector<8x16xf32>
    %130 = arith.mulf %2, %129 : vector<8x16xf32>
    %cst_44 = arith.constant dense<0.000000e+00> : vector<8xf32>
    %131 = vector.multi_reduction <add>, %130, %cst_44 [1] : vector<8x16xf32> to vector<8xf32>
    %132 = vector.shape_cast %131 : vector<8xf32> to vector<8x1xf32>
    %133 = arith.addf %127, %132 : vector<8x1xf32>
    %134 = vector.extract_strided_slice %116 {offsets = [3, 0], sizes = [1, 32], strides = [1, 1]} : vector<9x32xf32> to vector<1x32xf32>
    %135 = vector.broadcast %134 : vector<1x32xf32> to vector<8x32xf32>
    %136 = arith.mulf %40, %135 : vector<8x32xf32>
    %cst_45 = arith.constant dense<0.000000e+00> : vector<8xf32>
    %137 = vector.multi_reduction <add>, %136, %cst_45 [1] : vector<8x32xf32> to vector<8xf32>
    %138 = vector.shape_cast %137 : vector<8xf32> to vector<8x1xf32>
    %139 = arith.addf %133, %138 : vector<8x1xf32>
    %140 = vector.extract_strided_slice %116 {offsets = [4, 0], sizes = [1, 32], strides = [1, 1]} : vector<9x32xf32> to vector<1x32xf32>
    %141 = vector.broadcast %140 : vector<1x32xf32> to vector<8x32xf32>
    %142 = arith.mulf %0, %141 : vector<8x32xf32>
    %cst_46 = arith.constant dense<0.000000e+00> : vector<8xf32>
    %143 = vector.multi_reduction <add>, %142, %cst_46 [1] : vector<8x32xf32> to vector<8xf32>
    %144 = vector.shape_cast %143 : vector<8xf32> to vector<8x1xf32>
    %145 = arith.addf %139, %144 : vector<8x1xf32>
    %146 = arith.negf %145 : vector<8x1xf32>
    %147 = math.exp %146 : vector<8x1xf32>
    %cst_47 = arith.constant 1.000000e+00 : f32
    %148 = vector.broadcast %cst_47 : f32 to vector<8x1xf32>
    %149 = arith.addf %148, %147 : vector<8x1xf32>
    %150 = arith.divf %148, %149 : vector<8x1xf32>
    %151 = vector.broadcast %150 : vector<8x1xf32> to vector<8x32xf32>
    %152 = arith.mulf %151, %80 : vector<8x32xf32>
    %cst_48 = arith.constant 1.000000e+00 : f32
    %153 = vector.broadcast %cst_48 : f32 to vector<8x1xf32>
    %154 = arith.subf %153, %150 : vector<8x1xf32>
    %155 = vector.broadcast %154 : vector<8x1xf32> to vector<8x32xf32>
    %156 = arith.mulf %155, %115 : vector<8x32xf32>
    %157 = arith.addf %152, %156 : vector<8x32xf32>
    %c0_49 = arith.constant 0 : index
    %c0_50 = arith.constant 0 : index
    %158 = vector.load %arg12[%c0_49, %c0_50] : memref<81x32xf32, #tpu.memory_space<vmem>>, vector<81x32xf32>
    %159 = tpu.concatenate %157, %40, %2 in 1 : vector<8x32xf32>, vector<8x32xf32>, vector<8x16xf32> -> vector<8x80xf32>
    %160 = vector.extract_strided_slice %158 {offsets = [0, 0], sizes = [80, 32], strides = [1, 1]} : vector<81x32xf32> to vector<80x32xf32>
    %cst_51 = arith.constant dense<0.000000e+00> : vector<8x32xf32>
    %161 = tpu.matmul %159, %160, %cst_51 {dimension_numbers = #tpu.dot_dimension_numbers<[1], [0], [0], [1], [0, 0, 1, 1], [], []>} : vector<8x80xf32>, vector<80x32xf32>, vector<8x32xf32> -> vector<8x32xf32>
    %162 = vector.extract_strided_slice %158 {offsets = [80, 0], sizes = [1, 32], strides = [1, 1]} : vector<81x32xf32> to vector<1x32xf32>
    %163 = vector.broadcast %162 : vector<1x32xf32> to vector<8x32xf32>
    %164 = arith.addf %161, %163 : vector<8x32xf32>
    %c0_52 = arith.constant 0 : index
    %c0_53 = arith.constant 0 : index
    %165 = vector.load %arg13[%c0_52, %c0_53] : memref<33x128xf32, #tpu.memory_space<vmem>>, vector<33x128xf32>
    %166 = vector.extract_strided_slice %165 {offsets = [0, 0], sizes = [32, 128], strides = [1, 1]} : vector<33x128xf32> to vector<32x128xf32>
    %cst_54 = arith.constant dense<0.000000e+00> : vector<8x128xf32>
    %167 = tpu.matmul %164, %166, %cst_54 {dimension_numbers = #tpu.dot_dimension_numbers<[1], [0], [0], [1], [0, 0, 1, 1], [], []>} : vector<8x32xf32>, vector<32x128xf32>, vector<8x128xf32> -> vector<8x128xf32>
    %168 = vector.extract_strided_slice %165 {offsets = [32, 0], sizes = [1, 128], strides = [1, 1]} : vector<33x128xf32> to vector<1x128xf32>
    %169 = vector.broadcast %168 : vector<1x128xf32> to vector<8x128xf32>
    %170 = arith.addf %167, %169 : vector<8x128xf32>
    %cst_55 = arith.constant dense<0xFF800000> : vector<8xf32>
    %171 = vector.multi_reduction <maximumf>, %170, %cst_55 [1] : vector<8x128xf32> to vector<8xf32>
    %172 = vector.shape_cast %171 : vector<8xf32> to vector<8x1xf32>
    %173 = vector.broadcast %172 : vector<8x1xf32> to vector<8x128xf32>
    %174 = arith.subf %170, %173 : vector<8x128xf32>
    %175 = math.exp %174 : vector<8x128xf32>
    %cst_56 = arith.constant dense<0.000000e+00> : vector<8xf32>
    %176 = vector.multi_reduction <add>, %175, %cst_56 [1] : vector<8x128xf32> to vector<8xf32>
    %177 = vector.shape_cast %176 : vector<8xf32> to vector<8x1xf32>
    %178 = vector.broadcast %177 : vector<8x1xf32> to vector<8x128xf32>
    %179 = arith.divf %175, %178 : vector<8x128xf32>
    %180 = vector.extract_strided_slice %116 {offsets = [5, 0], sizes = [1, 32], strides = [1, 1]} : vector<9x32xf32> to vector<1x32xf32>
    %181 = vector.broadcast %180 : vector<1x32xf32> to vector<8x32xf32>
    %182 = arith.mulf %157, %181 : vector<8x32xf32>
    %cst_57 = arith.constant dense<0.000000e+00> : vector<8xf32>
    %183 = vector.multi_reduction <add>, %182, %cst_57 [1] : vector<8x32xf32> to vector<8xf32>
    %184 = vector.shape_cast %183 : vector<8xf32> to vector<8x1xf32>
    %185 = vector.extract_strided_slice %116 {offsets = [6, 0], sizes = [1, 32], strides = [1, 1]} : vector<9x32xf32> to vector<1x32xf32>
    %186 = vector.broadcast %185 : vector<1x32xf32> to vector<8x32xf32>
    %187 = arith.mulf %40, %186 : vector<8x32xf32>
    %cst_58 = arith.constant dense<0.000000e+00> : vector<8xf32>
    %188 = vector.multi_reduction <add>, %187, %cst_58 [1] : vector<8x32xf32> to vector<8xf32>
    %189 = vector.shape_cast %188 : vector<8xf32> to vector<8x1xf32>
    %190 = arith.addf %184, %189 : vector<8x1xf32>
    %191 = vector.extract_strided_slice %116 {offsets = [7, 0], sizes = [1, 32], strides = [1, 1]} : vector<9x32xf32> to vector<1x32xf32>
    %192 = vector.broadcast %191 : vector<1x32xf32> to vector<8x32xf32>
    %193 = arith.mulf %0, %192 : vector<8x32xf32>
    %cst_59 = arith.constant dense<0.000000e+00> : vector<8xf32>
    %194 = vector.multi_reduction <add>, %193, %cst_59 [1] : vector<8x32xf32> to vector<8xf32>
    %195 = vector.shape_cast %194 : vector<8xf32> to vector<8x1xf32>
    %196 = arith.addf %190, %195 : vector<8x1xf32>
    %197 = vector.extract_strided_slice %116 {offsets = [8, 0], sizes = [1, 1], strides = [1, 1]} : vector<9x32xf32> to vector<1x1xf32>
    %198 = vector.broadcast %197 : vector<1x1xf32> to vector<8x1xf32>
    %199 = arith.addf %196, %198 : vector<8x1xf32>
    %200 = arith.negf %199 : vector<8x1xf32>
    %201 = math.exp %200 : vector<8x1xf32>
    %cst_60 = arith.constant 1.000000e+00 : f32
    %202 = vector.broadcast %cst_60 : f32 to vector<8x1xf32>
    %203 = arith.addf %202, %201 : vector<8x1xf32>
    %204 = arith.divf %202, %203 : vector<8x1xf32>
    %cst_61 = arith.constant 1.000000e+00 : f32
    %205 = vector.broadcast %cst_61 : f32 to vector<8x1xf32>
    %206 = arith.subf %205, %204 : vector<8x1xf32>
    %207 = vector.broadcast %206 : vector<8x1xf32> to vector<8x16xf32>
    %208 = arith.mulf %207, %75 : vector<8x16xf32>
    %209 = tpu.iota {dimensions = array<i32: 2>} : vector<8x16x128xi32>
    %c0_62 = arith.constant 0 : index
    %c0_63 = arith.constant 0 : index
    %210 = vector.load %arg6[%c0_62, %c0_63] : memref<8x16xi32, #tpu.memory_space<vmem>>, vector<8x16xi32>
    %211 = vector.shape_cast %210 : vector<8x16xi32> to vector<8x16x1xi32>
    %212 = vector.broadcast %211 : vector<8x16x1xi32> to vector<8x16x128xi32>
    %213 = arith.cmpi eq, %209, %212 : vector<8x16x128xi32>
    %214 = vector.shape_cast %208 : vector<8x16xf32> to vector<8x16x1xf32>
    %cst_64 = arith.constant 0.000000e+00 : f32
    %215 = vector.shape_cast %214 : vector<8x16x1xf32> to vector<8x16x1xf32>
    %216 = vector.broadcast %215 : vector<8x16x1xf32> to vector<8x16x128xf32>
    %217 = vector.broadcast %cst_64 : f32 to vector<8x16x128xf32>
    %218 = arith.select %213, %216, %217 : vector<8x16x128xi1>, vector<8x16x128xf32>
    %cst_65 = arith.constant dense<0.000000e+00> : vector<8x128xf32>
    %219 = vector.multi_reduction <add>, %218, %cst_65 [1] : vector<8x16x128xf32> to vector<8x128xf32>
    %220 = vector.broadcast %204 : vector<8x1xf32> to vector<8x128xf32>
    %221 = arith.mulf %220, %179 : vector<8x128xf32>
    %222 = arith.addf %221, %219 : vector<8x128xf32>
    %c0_66 = arith.constant 0 : index
    %c0_67 = arith.constant 0 : index
    %223 = vector.load %arg14[%c0_66, %c0_67] : memref<8x128xf32, #tpu.memory_space<vmem>>, vector<8x128xf32>
    tpu.vector_store %arg14[%c0_66, %c0_67], %222 {strides = array<i32>} : memref<8x128xf32, #tpu.memory_space<vmem>>, vector<8x128xf32>,
    %cst_68 = arith.constant 0.000000e+00 : f32
    %224 = vector.broadcast %cst_68 : f32 to vector<8x47xf32>
    %225 = tpu.concatenate %40, %157, %75, %204, %224 in 1 : vector<8x32xf32>, vector<8x32xf32>, vector<8x16xf32>, vector<8x1xf32>, vector<8x47xf32> -> vector<8x128xf32>
    %c0_69 = arith.constant 0 : index
    %c0_70 = arith.constant 0 : index
    %226 = vector.load %arg15[%c0_69, %c0_70] : memref<8x128xf32, #tpu.memory_space<vmem>>, vector<8x128xf32>
    tpu.vector_store %arg15[%c0_69, %c0_70], %225 {strides = array<i32>} : memref<8x128xf32, #tpu.memory_space<vmem>>, vector<8x128xf32>,
    return
  }
}

</mosaic_0001>

<bundles_post_ra>
// kernel: tpu_custom_call.1
= control target key start
LH: loop header
LB: loop body
LE: loop exit
PB: predicated region body
PF: predicated region fallthrough
CT: control target
= control target key end

     0   :  { %21 = vsyncpa [#allocation3], 0  ;;  %v2906_v3 = vmov 0.0|0.0   ;;  %vm2907_vm0 = vmmov 0   ;;  %v2908_v11 = vmov 0.0   ;;  %s3921_s0 = inlined_call_operand.vmem [shape: f32[8,32], index: 0, kind: input, shape index: {}]   ;;  %s3922_s1 = inlined_call_operand.vmem [shape: f32[8,16], index: 1, kind: input, shape index: {}]   ;;  %s3923_s2 = inlined_call_operand.vmem [shape: f32[8,32], index: 2, kind: input, shape index: {}]   ;;  %s3924_s3 = inlined_call_operand.vmem [shape: f32[128,32], index: 3, kind: input, shape index: {}]   ;;  %s3925_s4 = inlined_call_operand.vmem [shape: f32[128,32], index: 4, kind: input, shape index: {}]   ;;  %s3926_s5 = inlined_call_operand.vmem [shape: f32[8,16], index: 5, kind: input, shape index: {}]   ;;  %s3927_s6 = inlined_call_operand.vmem [shape: s32[8,16], index: 6, kind: input, shape index: {}]   ;;  %s3928_s7 = inlined_call_operand.vmem [shape: f32[66,96], index: 7, kind: input, shape index: {}]   ;;  %s3929_s8 = inlined_call_operand.vmem [shape: f32[32,64], index: 8, kind: input, shape index: {}]   ;;  %s3930_s9 = inlined_call_operand.vmem [shape: f32[48,64], index: 9, kind: input, shape index: {}]   ;;  %s3931_s10 = inlined_call_operand.vmem [shape: f32[2,32], index: 10, kind: input, shape index: {}]   ;;  %s3932_s11 = inlined_call_operand.vmem [shape: f32[9,32], index: 11, kind: input, shape index: {}]   ;;  %s3933_s12 = inlined_call_operand.vmem [shape: f32[81,32], index: 12, kind: input, shape index: {}]   ;;  %s3934_s13 = inlined_call_operand.vmem [shape: f32[33,128], index: 13, kind: input, shape index: {}]   ;;  %s3935_s14 = inlined_call_operand.hbm [shape: f32[8,128], index: 14, kind: output, shape index: {0}]   ;;  %s3936_s15 = inlined_call_operand.hbm [shape: f32[8,128], index: 15, kind: output, shape index: {1}]  }
   0x1   :  { %v55_v0 = vld [vmem:[%s3928_s7] sm:$0xff]  ;;  %v56_v1 = vld [vmem:[%s3928_s7 + $0x8] sm:$0xff]  ;;  %2654 = vmatprep.subr.bf16.mxu0 %v2906_v3  ;;  %2660 = vmatprep.subr.bf16.mxu1 %v2906_v3  ;;  %v57_v6 = vld [vmem:[%s3928_s7 + $0x10] sm:$0xff] }
   0x2   :  { %v59_v2 = vld [vmem:[%s3928_s7 + $0x20] sm:$0xff]  ;;  %v2655_v4 = vpack.c.bf16 %v56_v1, %v55_v0  ;;  %v60_v5 = vld [vmem:[%s3928_s7 + $0x28] sm:$0xff]  ;;  %v58_v7 = vld [vmem:[%s3928_s7 + $0x18] sm:$0xff]  ;;  %2527 = vmatprep.mubr.msk.f32.mxu0 %vm2907_vm0, %v2908_v11  ;;  %2538 = vmatprep.mubr.msk.f32.mxu1 %vm2907_vm0, %v2908_v11 }
   0x3   :  { %v2661_v8 = vpack.c.bf16 %v60_v5, %v59_v2  ;;  %v61_v9 = vld [vmem:[%s3928_s7 + $0x30] sm:$0xff]  ;;  %v62_v10 = vld [vmem:[%s3928_s7 + $0x38] sm:$0xff]  ;;  %v2658_v12 = vpack.c.bf16 %v58_v7, %v57_v6 }
   0x4   :  { %2656 = vmatpush3.bf16.msra.mxu0 %v2655_v4 }
   0x5   :  { %22 = vsyncpa [#allocation5], 0  ;;  %2662 = vmatpush3.bf16.msra.mxu1 %v2661_v8  ;;  %2657 = vmatprep.subr.bf16.mxu0 %v2906_v3  ;;  %v2664_v13 = vpack.c.bf16 %v62_v10, %v61_v9  ;;  %v51_v14 = vld [vmem:[%s3921_s0] sm:$0xff]  ;;  %vm68_vm1 = vcmask 261120   ;;  %v64_v16 = vlaneseq  ;;  %v3067_v39 = vld [vmem:[%s3929_s8 + $0x8] sm:$0xff]  ;;  %s2910_s19 = smov 96  }
   0x6   :  { %2663 = vmatprep.subr.bf16.mxu1 %v2906_v3  ;;  %v52_v15 = vld [vmem:[%s3923_s2] sm:$0xff]  ;;  %s2909_s2 = smov 64   ;;  %v339_v40 = vld [vmem:[%s3929_s8 + $0x10] sm:$0xff]  ;;  %v340_v42 = vld [vmem:[%s3929_s8 + $0x18] sm:$0xff]  ;;  %s2911_s28 = smov 32   ;;  %vm263_vm2 = vcmask 392192  }
   0x7   :  { %v3041_v17 = vshrl.u32 %v64_v16, 7  ;;  %v63_v19 = vld [vmem:[%s3928_s7 + $0x40] sm:$0x3]  ;;  %v2679_v44 = vpack.c.bf16 %v340_v42, %v339_v40  ;;  %v258_v48 = vld [vmem:[%s3930_s9 + $0x8] sm:$0xff]  ;;  %v259_v50 = vld [vmem:[%s3930_s9 + $0x10] sm:$0xff]  ;;  %v2728_v60 = vpack.i.bf16 %v340_v42, %v339_v40  ;;  %vm769_vm3 = vcmask 130112  }
   0x8   :  { %2659 = vmatpush3.bf16.msra.mxu0 %v2658_v12  ;;  %v3062_v38 = vld [vmem:[%s3929_s8] sm:$0xff]  ;;  %v260_v51 = vld [vmem:[%s3930_s9 + $0x18] sm:$0xff]  ;;  %v343_v52 = vld [vmem:[%s3924_s3 + $0x8] sm:$0xff]  ;;  %vm834_vm4 = vcmask 1041409   ;;  %vm836_vm5 = vcmask 1042434   ;;  %vm838_vm6 = vcmask 1043459  }
   0x9   :  { %2665 = vmatpush3.bf16.msra.mxu1 %v2664_v13  ;;  %2666 = vmatprep.subr.bf16.mxu0 %v2906_v3  ;;  %v3044_v18 = vsub.s32 1, %v3041_v17  ;;  %v3052_v26 = vsub.s32 0, %v3041_v17  ;;  %v2675_v41 = vpack.c.bf16 %v3067_v39, %v3062_v38  ;;  %v2723_v43 = vpack.i.bf16 %v3067_v39, %v3062_v38  ;;  %v342_v46 = vld [vmem:[%s3924_s3] sm:$0xff]  ;;  %v344_v54 = vld [vmem:[%s3924_s3 + $0x10] sm:$0xff]  ;;  %v262_v56 = vld [vmem:[%s3930_s9 + $0x28] sm:$0xff] }
   0xa   :  { %v257_v47 = vld [vmem:[%s3930_s9] sm:$0xff]  ;;  %v2670_v53 = vpack.c.bf16 %v260_v51, %v259_v50  ;;  %v345_v58 = vld [vmem:[%s3924_s3 + $0x18] sm:$0xff]  ;;  %v347_v62 = vld [vmem:[%s3924_s3 + $0x28] sm:$0xff]  ;;  %vm840_vm7 = vcmask 1044484   ;;  %vm3939_vm8 = vcmask 1045509   ;;  %vm3938_vm9 = vcmask 1046534  }
   0xb   :  { %2528 = vmatmul.mubr.msk.f32.vlgmr.msra.gmra.mrb[0].mxu0 %vm68_vm1, %v51_v14  ;;  %v145_v20 = vrot.slane %v63_v19, %v3044_v18  ;;  %v67_v27 = vrot.slane %v63_v19, %v3052_v26  ;;  %2676 = vmatprep.subr.bf16.mxu1 %v2675_v41  ;;  %v2667_v49 = vpack.c.bf16 %v258_v48, %v257_v47  ;;  %v261_v55 = vld [vmem:[%s3930_s9 + $0x20] sm:$0xff]  ;;  %v348_v63 = vld [vmem:[%s3924_s3 + $0x30] sm:$0xff]  ;;  %v349_v0 = vld [vmem:[%s3924_s3 + $0x38] sm:$0xff]  ;;  %vm3937_vm10 = vcmask 1047559  }
   0xc   :  { %2539 = vmatmul.mubr.msk.f32.vlgmr.msra.gmra.mrb[0].mxu1 %vm68_vm1, %v52_v15  ;;  %2553 = vmatprep.mubr.msk.f32.mxu0 %vm2907_vm0, %v2908_v11  ;;  %v53_v57 = vld [vmem:[%s3922_s1] sm:$0xff]  ;;  %v2673_v59 = vpack.c.bf16 %v262_v56, %v261_v55  ;;  %v351_v2 = vld [vmem:[%s3924_s3 + $0x48] sm:$0xff]  ;;  %v352_v4 = vld [vmem:[%s3924_s3 + $0x50] sm:$0xff]  ;;  %vm850_vm12 = vcmask 130048   ;;  %vm1846_vm13 = vcmask 523264   ;;  %vm1852_vm14 = vcmask 654336  }
   0xd   :  { %2678 = vmatpush3.bf16.msra.mxu1 %v2675_v41  ;;  %2564 = vmatprep.mubr.msk.f32.mxu1 %vm68_vm1, %v342_v46  ;;  %v346_v61 = vld [vmem:[%s3924_s3 + $0x20] sm:$0xff]  ;;  %v353_v5 = vld [vmem:[%s3924_s3 + $0x58] sm:$0xff]  ;;  %v355_v8 = vld [vmem:[%s3924_s3 + $0x68] sm:$0xff] }
   0xe   :  { %2680 = vmatprep.subr.bf16.mxu1 %v2679_v44  ;;  %2668 = vmatpush3.bf16.msra.mxu0 %v2667_v49  ;;  %v350_v1 = vld [vmem:[%s3924_s3 + $0x40] sm:$0xff]  ;;  %v356_v9 = vld [vmem:[%s3924_s3 + $0x70] sm:$0xff]  ;;  %v1043_v38 = vld [vmem:[%s3925_s4 + $0x18] sm:$0xff] }
   0xf   :  { %2669 = vmatprep.subr.bf16.mxu0 %v2906_v3  ;;  %v354_v6 = vld [vmem:[%s3924_s3 + $0x60] sm:$0xff]  ;;  %v1045_v40 = vld [vmem:[%s3925_s4 + $0x28] sm:$0xff]  ;;  %v1046_v41 = vld [vmem:[%s3925_s4 + $0x30] sm:$0xff] }
  0x10   :  { %v1044_v39 = vld [vmem:[%s3925_s4 + $0x20] sm:$0xff]  ;;  %v1047_v42 = vld [vmem:[%s3925_s4 + $0x38] sm:$0xff]  ;;  %v1053_v48 = vld [vmem:[%s3925_s4 + $0x68] sm:$0xff] }
  0x11   :  { %2682 = vmatpush3.bf16.msra.mxu1 %v2679_v44  ;;  %v1049_v44 = vld [vmem:[%s3925_s4 + $0x48] sm:$0xff]  ;;  %v1051_v46 = vld [vmem:[%s3925_s4 + $0x58] sm:$0xff]  ;;  %v1052_v47 = vld [vmem:[%s3925_s4 + $0x60] sm:$0xff] }
  0x12   :  { %2691 = vmatprep.subr.bf16.mxu1 %v2906_v3  ;;  %2671 = vmatpush3.bf16.msra.mxu0 %v2670_v53  ;;  %v1054_v49 = vld [vmem:[%s3925_s4 + $0x70] sm:$0xff]  ;;  %v1055_v50 = vld [vmem:[%s3925_s4 + $0x78] sm:$0xff] }
  0x13   :  { %2672 = vmatprep.subr.bf16.mxu0 %v2906_v3 }
  0x14   :  { %2565 = vmatmul.mubr.msk.f32.vlgmr.msra.gmra.mrb[2].mxu1 %vm68_vm1, %v343_v52 }
  0x15   :  { %2567 = vmatprep.mubr.msk.f32.mxu1 %vm68_vm1, %v344_v54 }
  0x16   :  { %2674 = vmatpush3.bf16.msra.mxu0 %v2673_v59 }
  0x18   :  { %2568 = vmatmul.mubr.msk.f32.gmra.mrb[4].mxu1 %vm68_vm1, %v345_v58 }
  0x19   :  { %2570 = vmatprep.mubr.msk.f32.mxu1 %vm68_vm1, %v346_v61 }
  0x1c   :  { %2571 = vmatmul.mubr.msk.f32.gmra.mrb[6].mxu1 %vm68_vm1, %v347_v62 }
  0x1d   :  { %2573 = vmatprep.mubr.msk.f32.mxu1 %vm68_vm1, %v348_v63 }
  0x20   :  { %2574 = vmatmul.mubr.msk.f32.gmra.mrb[8].mxu1 %vm68_vm1, %v349_v0  ;;  %v2912_v0 = vmov 1966171168  }
  0x21   :  { %2576 = vmatprep.mubr.msk.f32.mxu1 %vm68_vm1, %v350_v1  ;;  %v554_v1 = vunpack.c.l.s4 %v2912_v0 }
  0x24   :  { %2577 = vmatmul.mubr.msk.f32.gmra.mrb[10].mxu1 %vm68_vm1, %v351_v2  ;;  %v555_v2 = vunpack.c.0.s8 %v554_v1 }
  0x25   :  { %2579 = vmatprep.mubr.msk.f32.mxu1 %vm68_vm1, %v352_v4 }
  0x26   :  { %v558_v4 = vsub.s32 %v555_v2, %v3041_v17 }
  0x28   :  { %2580 = vmatmul.mubr.msk.f32.gmra.mrb[12].mxu1 %vm68_vm1, %v353_v5 }
  0x29   :  { %2582 = vmatprep.mubr.msk.f32.mxu1 %vm68_vm1, %v354_v6 }
  0x2c   :  { %2583 = vmatmul.mubr.msk.f32.gmra.mrb[14].mxu1 %vm68_vm1, %v355_v8 }
  0x2d   :  { %2585 = vmatprep.mubr.msk.f32.mxu1 %vm68_vm1, %v356_v9 }
  0xde   :  { %v138_v21 = vpop.f32.mrb[0].mxu0 }
  0xdf   :  { %v215_v22 = vpop.f32.mrb[0].mxu1  ;;  %v2529_v23 = vpop.f32.mrb[1].mxu0  ;;  %v139_v28 = vadd.f32 %v138_v21, %v67_v27  ;;  %v1040_v27 = vld [vmem:[%s3925_s4] sm:$0xff] }
  0xe0   :  { %v216_v24 = vadd.f32 %v215_v22, %v145_v20  ;;  %v2540_v25 = vpop.f32.mrb[1].mxu1 }
  0xe2   :  { %227 = vrot.lane.b32.xlu0 %v216_v24, %s2909_s2  ;;  %v219_v29 = vadd.f32 %v216_v24, %v139_v28 }
  0xe4   :  { %v2405_v30 = vmul.f32 -1.442695, %v219_v29 }
  0xe6   :  { %2734 = vpow2.f32 %v2405_v30 }
  0xe7   :  { %v3183_v20 = vpop.f32.mrb[2].mxu1 }
  0xe8   :  { %v3185_v21 = vpop.f32.mrb[3].mxu1 }
  0xeb   :  { %v3187_v22 = vpop.f32.mrb[4].mxu1 }
  0xec   :  { %v482_v51 = vpop.f32.mrb[5].mxu1 }
  0xef   :  { %v2572_v52 = vpop.f32.mrb[6].mxu1 }
  0xf0   :  { %v2735_v31 = vpop.eup %2734  ;;  %v492_v53 = vpop.f32.mrb[7].mxu1 }
  0xf1   :  { %v223_v32 = vadd.f32 1.0, %v2735_v31 }
  0xf3   :  { %2736 = vrcp.f32 %v223_v32  ;;  %v2575_v54 = vpop.f32.mrb[8].mxu1 }
  0xf4   :  { %v502_v55 = vpop.f32.mrb[9].mxu1 }
  0xf7   :  { %v2578_v56 = vpop.f32.mrb[10].mxu1 }
  0xfd   :  { %v3055_v33 = vpop.eup %2736 }
  0xfe   :  { %v237_v10 = vsub.f32 1.0, %v3055_v33 }
 0x154   :  { %v228_v34 = vpop.permute.xlu0 %227 }
 0x155   :  { %v230_v35 = vmul.f32 %v3055_v33, %v228_v34 }
 0x157   :  { %232 = vrot.lane.b32.xlu0 %v230_v35, %s2909_s2 }
 0x1c9   :  { %v233_v36 = vpop.permute.xlu0 %232 }
 0x1ca   :  { %v235_v37 = vadd.f32 %v233_v36, %v139_v28  ;;  %v1041_v36 = vld [vmem:[%s3925_s4 + $0x8] sm:$0xff] }
 0x1cc   :  { %2738 = vtanh.f32 %v235_v37  ;;  %v1042_v37 = vld [vmem:[%s3925_s4 + $0x10] sm:$0xff] }
 0x1d6   :  { %v2739_v45 = vpop.eup %2738 }
 0x1d7   :  { %239 = vrot.lane.b32.xlu1 %v2739_v45, %s2910_s19  ;;  %v1050_v45 = vld [vmem:[%s3925_s4 + $0x50] sm:$0xff] }
 0x1db   :  { %243 = vrot.lane.b32.xlu1 %v52_v15, %s2911_s28  ;;  %v357_v15 = vld [vmem:[%s3924_s3 + $0x78] sm:$0xff] }
 0x1dc   :  { %2586 = vmatmul.mubr.msk.f32.gmra.mrb[16].mxu1 %vm68_vm1, %v357_v15 }
 0x1dd   :  { %2640 = vmatprep.mubr.msk.f32.mxu1 %vm2907_vm0, %v2908_v11 }
 0x1df   :  { %253 = vrot.lane.b32.xlu1 %v53_v57, %s2911_s28  ;;  %v512_v57 = vpop.f32.mrb[11].mxu1 }
 0x1e0   :  { %v2581_v58 = vpop.f32.mrb[12].mxu1 }
 0x1e1   :  { %v522_v59 = vpop.f32.mrb[13].mxu1 }
 0x1e3   :  { %2729 = vrot.lane.b32.xlu1 %v2728_v60, %s2910_s19  ;;  %v2584_v60 = vpop.f32.mrb[14].mxu1 }
 0x1e4   :  { %v532_v61 = vpop.f32.mrb[15].mxu1 }
 0x249   :  { %v240_v7 = vpop.permute.xlu1 %239 }
 0x24a   :  { %v242_v13 = vmul.f32 %v240_v7, %v237_v10 }
 0x24d   :  { %v244_v12 = vpop.permute.xlu1 %243 }
 0x24e   :  { %v246_v14 = vmul.f32 %v3055_v33, %v244_v12 }
 0x250   :  { %v3172_v19 = vadd.f32 %v246_v14, %v242_v13 }
 0x251   :  { %v254_v23 = vpop.permute.xlu1 %253 }
 0x252   :  { %249 = vrot.lane.b32.xlu0 %v3172_v19, %s2910_s19 }
 0x255   :  { %v2730_v25 = vpop.permute.xlu1 %2729 }
 0x256   :  { %2724 = vrot.lane.b32.xlu0 %v2723_v43, %s2910_s19  ;;  %v2732_v29 = vunpack.i.h.bf16 %v2730_v25  ;;  %v2731_v30 = vunpack.i.l.bf16 %v2730_v25  ;;  %v1048_v43 = vld [vmem:[%s3925_s4 + $0x40] sm:$0xff] }
 0x258   :  { %v2687_v35 = vpack.c.bf16 %v2732_v29, %v2731_v30 }
 0x2af   :  { %v2587_v62 = vpop.f32.mrb[16].mxu1 }
 0x2b0   :  { %v542_v63 = vpop.f32.mrb[17].mxu1 }
 0x2c4   :  { %v3189_v24 = vpop.permute.xlu0 %249 }
 0x2c5   :  { %v256_v28 = vsel %vm68_vm1, %v3189_v24, %v254_v23 }
 0x2c6   :  { %2554 = vmatmul.mubr.msk.f32.vlgmr.msra.gmra.mrb[2].mxu0 %vm263_vm2, %v256_v28 }
 0x2c7   :  { %2596 = vmatprep.mubr.msk.f32.mxu0 %vm68_vm1, %v1040_v27 }
 0x2c8   :  { %v2725_v31 = vpop.permute.xlu0 %2724 }
 0x2c9   :  { %v2727_v32 = vunpack.i.h.bf16 %v2725_v31  ;;  %v2726_v33 = vunpack.i.l.bf16 %v2725_v31 }
 0x2cb   :  { %v2683_v34 = vpack.c.bf16 %v2727_v32, %v2726_v33 }
 0x2cd   :  { %2684 = vmatprep.subr.bf16.mxu0 %v2683_v34 }
 0x2ce   :  { %2686 = vmatpush3.bf16.msra.mxu0 %v2683_v34 }
 0x2cf   :  { %2688 = vmatprep.subr.bf16.mxu0 %v2687_v35 }
 0x2d2   :  { %2690 = vmatpush3.bf16.msra.mxu0 %v2687_v35 }
 0x2d5   :  { %2597 = vmatmul.mubr.msk.f32.vlgmr.msra.gmra.mrb[4].mxu0 %vm68_vm1, %v1041_v36 }
 0x2d6   :  { %2599 = vmatprep.mubr.msk.f32.mxu0 %vm68_vm1, %v1042_v37 }
 0x2d9   :  { %2600 = vmatmul.mubr.msk.f32.gmra.mrb[6].mxu0 %vm68_vm1, %v1043_v38 }
 0x2da   :  { %2602 = vmatprep.mubr.msk.f32.mxu0 %vm68_vm1, %v1044_v39 }
 0x2dd   :  { %2603 = vmatmul.mubr.msk.f32.gmra.mrb[8].mxu0 %vm68_vm1, %v1045_v40 }
 0x2de   :  { %2605 = vmatprep.mubr.msk.f32.mxu0 %vm68_vm1, %v1046_v41 }
 0x2e1   :  { %2606 = vmatmul.mubr.msk.f32.gmra.mrb[10].mxu0 %vm68_vm1, %v1047_v42 }
 0x2e2   :  { %2608 = vmatprep.mubr.msk.f32.mxu0 %vm68_vm1, %v1048_v43 }
 0x2e5   :  { %2609 = vmatmul.mubr.msk.f32.gmra.mrb[12].mxu0 %vm68_vm1, %v1049_v44 }
 0x2e6   :  { %2611 = vmatprep.mubr.msk.f32.mxu0 %vm68_vm1, %v1050_v45 }
 0x2e9   :  { %2612 = vmatmul.mubr.msk.f32.gmra.mrb[14].mxu0 %vm68_vm1, %v1051_v46 }
 0x2ea   :  { %2614 = vmatprep.mubr.msk.f32.mxu0 %vm68_vm1, %v1052_v47 }
 0x2ed   :  { %2615 = vmatmul.mubr.msk.f32.gmra.mrb[16].mxu0 %vm68_vm1, %v1053_v48 }
 0x2ee   :  { %2617 = vmatprep.mubr.msk.f32.mxu0 %vm68_vm1, %v1054_v49 }
 0x2f1   :  { %2618 = vmatmul.mubr.msk.f32.gmra.mrb[18].mxu0 %vm68_vm1, %v1055_v50 }
 0x399   :  { %v333_v5 = vpop.f32.mrb[2].mxu0 }
 0x39a   :  { %v552_v6 = vcombine.high %v333_v5, %v333_v5  ;;  %v559_v7 = vrot.slane %v333_v5, %v558_v4  ;;  %v2555_v8 = vpop.f32.mrb[3].mxu0 }
 0x39c   :  { %v566_v9 = vrot.slane %v552_v6, %v558_v4  ;;  %v567_v10 = vcombine.high %v559_v7, %v559_v7  ;;  %v575_v12 = vrot.slane %v559_v7, %v558_v4 }
 0x39e   :  { %v568_v13 = vcombine.high %v566_v9, %v566_v9  ;;  %v582_v14 = vrot.slane %v566_v9, %v558_v4  ;;  %v589_v15 = vrot.slane %v567_v10, %v558_v4  ;;  %v597_v23 = vcombine.high %v575_v12, %v575_v12 }
 0x39f   :  { %v604_v25 = vrot.slane %v575_v12, %v3052_v26 }
 0x3a0   :  { %v608_v27 = vrot.slane %v589_v15, %v3052_v26  ;;  %v612_v28 = vrot.slane %v597_v23, %v3052_v26  ;;  %v599_v29 = vcombine.high %v589_v15, %v589_v15  ;;  %v620_v30 = vrot.slane %v582_v14, %v3052_v26 }
 0x3a1   :  { %v596_v31 = vrot.slane %v568_v13, %v558_v4  ;;  %1265 = vrot.lane.b32.xlu0 %v604_v25, %s2910_s19  ;;  %v641_v32 = vadd.f32 %v604_v25, %v3185_v21  ;;  %v642_v33 = vadd.f32 %v3183_v20, %v604_v25  ;;  %v598_v34 = vcombine.high %v582_v14, %v582_v14 }
 0x3a2   :  { %v643_v35 = vadd.f32 %v608_v27, %v482_v51  ;;  %v644_v36 = vadd.f32 %v3187_v22, %v608_v27  ;;  %v646_v37 = vadd.f32 %v2572_v52, %v612_v28  ;;  %v645_v38 = vadd.f32 %v612_v28, %v492_v53  ;;  %1267 = vrot.lane.b32.xlu1 %v608_v27, %s2910_s19 }
 0x3a3   :  { %v616_v39 = vrot.slane %v599_v29, %v3052_v26  ;;  %v650_v40 = vadd.f32 %v2578_v56, %v620_v30  ;;  %v649_v41 = vadd.f32 %v620_v30, %v512_v57  ;;  %v624_v42 = vrot.slane %v596_v31, %v3052_v26 }
 0x3a4   :  { %v628_v43 = vrot.slane %v598_v34, %v3052_v26  ;;  %v600_v44 = vcombine.high %v596_v31, %v596_v31  ;;  %2740 = vtanh.f32 %v641_v32 }
 0x3a5   :  { %v648_v21 = vadd.f32 %v2575_v54, %v616_v39  ;;  %v647_v45 = vadd.f32 %v616_v39, %v502_v55  ;;  %v652_v20 = vadd.f32 %v2581_v58, %v624_v42  ;;  %1269 = vrot.lane.b32.xlu0 %v612_v28, %s2910_s19  ;;  %v651_v46 = vadd.f32 %v624_v42, %v522_v59 }
 0x3a6   :  { %v3271_v22 = vadd.f32 %v2584_v60, %v628_v43  ;;  %v653_v47 = vadd.f32 %v628_v43, %v532_v61  ;;  %1271 = vrot.lane.b32.xlu1 %v616_v39, %s2910_s19  ;;  %v632_v48 = vrot.slane %v600_v44, %v3052_v26  ;;  %2742 = vtanh.f32 %v643_v35 }
 0x3a7   :  { %2744 = vtanh.f32 %v642_v33 }
 0x3a8   :  { %v3275_v49 = vpop.f32.mrb[4].mxu0  ;;  %v3277_v50 = vadd.f32 %v2587_v62, %v632_v48  ;;  %v3279_v51 = vadd.f32 %v632_v48, %v542_v63  ;;  %v3310_v63 = vld [vmem:[%s3931_s10] sm:$0x3]  ;;  %2746 = vtanh.f32 %v644_v36 }
 0x3a9   :  { %1273 = vrot.lane.b32.xlu0 %v620_v30, %s2910_s19  ;;  %v3282_v52 = vpop.f32.mrb[5].mxu0  ;;  %v3318_v2 = vrot.slane %v3310_v63, %v3052_v26  ;;  %2748 = vtanh.f32 %v645_v38 }
 0x3aa   :  { %1275 = vrot.lane.b32.xlu1 %v624_v42, %s2910_s19  ;;  %2750 = vtanh.f32 %v646_v37 }
 0x3ab   :  { %2752 = vtanh.f32 %v649_v41 }
 0x3ac   :  { %v3285_v53 = vpop.f32.mrb[6].mxu0  ;;  %2754 = vtanh.f32 %v650_v40 }
 0x3ad   :  { %1277 = vrot.lane.b32.xlu0 %v628_v43, %s2910_s19  ;;  %v3288_v54 = vpop.f32.mrb[7].mxu0  ;;  %2756 = vtanh.f32 %v647_v45 }
 0x3ae   :  { %1279 = vrot.lane.b32.xlu1 %v632_v48, %s2910_s19  ;;  %v2741_v4 = vpop.eup %2740  ;;  %2758 = vtanh.f32 %v648_v21 }
 0x3af   :  { %v677_v7 = vmul.f32 %v2741_v4, %v3318_v2  ;;  %2760 = vtanh.f32 %v651_v46 }
 0x3b0   :  { %v3291_v55 = vpop.f32.mrb[8].mxu0  ;;  %v2743_v8 = vpop.eup %2742  ;;  %2762 = vtanh.f32 %v652_v20 }
 0x3b1   :  { %v3293_v56 = vpop.f32.mrb[9].mxu0  ;;  %v2745_v9 = vpop.eup %2744  ;;  %v693_v10 = vsel %vm68_vm1, %v677_v7, 0.0  ;;  %v679_v12 = vmul.f32 %v2743_v8, %v3318_v2  ;;  %2764 = vtanh.f32 %v653_v47 }
 0x3b2   :  { %v2747_v13 = vpop.eup %2746  ;;  %v678_v14 = vmul.f32 %v2745_v9, %v3318_v2  ;;  %2766 = vtanh.f32 %v3271_v22 }
 0x3b3   :  { %v2749_v15 = vpop.eup %2748  ;;  %v699_v23 = vsel %vm68_vm1, %v679_v12, 0.0  ;;  %v680_v25 = vmul.f32 %v2747_v13, %v3318_v2  ;;  %2768 = vtanh.f32 %v3279_v51 }
 0x3b4   :  { %v3295_v57 = vpop.f32.mrb[10].mxu0  ;;  %v2751_v27 = vpop.eup %2750  ;;  %v696_v28 = vsel %vm68_vm1, %v678_v14, 0.0  ;;  %v681_v29 = vmul.f32 %v2749_v15, %v3318_v2  ;;  %2770 = vtanh.f32 %v3277_v50 }
 0x3b5   :  { %v3297_v58 = vpop.f32.mrb[11].mxu0  ;;  %v2753_v30 = vpop.eup %2752  ;;  %v702_v31 = vsel %vm68_vm1, %v680_v25, 0.0  ;;  %v682_v32 = vmul.f32 %v2751_v27, %v3318_v2 }
 0x3b6   :  { %v2755_v33 = vpop.eup %2754  ;;  %v705_v34 = vsel %vm68_vm1, %v681_v29, 0.0  ;;  %v685_v35 = vmul.f32 %v2753_v30, %v3318_v2 }
 0x3b7   :  { %v2757_v36 = vpop.eup %2756  ;;  %v708_v37 = vsel %vm68_vm1, %v682_v32, 0.0  ;;  %v686_v38 = vmul.f32 %v2755_v33, %v3318_v2 }
 0x3b8   :  { %v3299_v59 = vpop.f32.mrb[12].mxu0  ;;  %v2759_v39 = vpop.eup %2758  ;;  %v717_v40 = vsel %vm68_vm1, %v685_v35, 0.0  ;;  %v683_v41 = vmul.f32 %v2757_v36, %v3318_v2 }
 0x3b9   :  { %v3301_v60 = vpop.f32.mrb[13].mxu0  ;;  %v2761_v42 = vpop.eup %2760  ;;  %v720_v43 = vsel %vm68_vm1, %v686_v38, 0.0  ;;  %v684_v44 = vmul.f32 %v2759_v39, %v3318_v2 }
 0x3ba   :  { %v2763_v21 = vpop.eup %2762  ;;  %v711_v45 = vsel %vm68_vm1, %v683_v41, 0.0  ;;  %v687_v20 = vmul.f32 %v2761_v42, %v3318_v2 }
 0x3bb   :  { %v2765_v46 = vpop.eup %2764  ;;  %v714_v22 = vsel %vm68_vm1, %v684_v44, 0.0  ;;  %v688_v47 = vmul.f32 %v2763_v21, %v3318_v2 }
 0x3bc   :  { %v3303_v61 = vpop.f32.mrb[14].mxu0  ;;  %v2767_v48 = vpop.eup %2766  ;;  %v723_v50 = vsel %vm68_vm1, %v687_v20, 0.0  ;;  %v689_v51 = vmul.f32 %v2765_v46, %v3318_v2 }
 0x3bd   :  { %v3305_v62 = vpop.f32.mrb[15].mxu0  ;;  %v2769_v4 = vpop.eup %2768  ;;  %v726_v7 = vsel %vm68_vm1, %v688_v47, 0.0  ;;  %v690_v8 = vmul.f32 %v2767_v48, %v3318_v2 }
 0x3be   :  { %v2771_v9 = vpop.eup %2770  ;;  %v691_v12 = vmul.f32 %v2769_v4, %v3318_v2 }
 0x3bf   :  { %v732_v13 = vsel %vm68_vm1, %v690_v8, 0.0  ;;  %v692_v14 = vmul.f32 %v2771_v9, %v3318_v2 }
 0x3c0   :  { %v3312_v0 = vpop.f32.mrb[16].mxu0  ;;  %v735_v15 = vsel %vm68_vm1, %v691_v12, 0.0 }
 0x3c1   :  { %v3314_v1 = vpop.f32.mrb[17].mxu0 }
 0x3c4   :  { %v3320_v5 = vpop.f32.mrb[18].mxu0 }
 0x3c5   :  { %v3322_v6 = vpop.f32.mrb[19].mxu0 }
 0x3cc   :  { %694 = vadd.xlane.f32.xlu0 %v693_v10  ;;  %v729_v10 = vsel %vm68_vm1, %v689_v51, 0.0 }
 0x3d0   :  { %700 = vadd.xlane.f32.xlu0 %v699_v23  ;;  %v738_v23 = vsel %vm68_vm1, %v692_v14, 0.0 }
 0x3d2   :  { %697 = vadd.xlane.f32.xlu1 %v696_v28 }
 0x3d4   :  { %703 = vadd.xlane.f32.xlu0 %v702_v31 }
 0x3d6   :  { %706 = vadd.xlane.f32.xlu1 %v705_v34 }
 0x3d8   :  { %709 = vadd.xlane.f32.xlu0 %v708_v37 }
 0x3da   :  { %718 = vadd.xlane.f32.xlu1 %v717_v40 }
 0x3dc   :  { %721 = vadd.xlane.f32.xlu0 %v720_v43 }
 0x3de   :  { %712 = vadd.xlane.f32.xlu1 %v711_v45 }
 0x3e0   :  { %715 = vadd.xlane.f32.xlu0 %v714_v22 }
 0x3e2   :  { %724 = vadd.xlane.f32.xlu1 %v723_v50 }
 0x3e4   :  { %727 = vadd.xlane.f32.xlu0 %v726_v7 }
 0x3e6   :  { %730 = vadd.xlane.f32.xlu1 %v729_v10 }
 0x3e8   :  { %733 = vadd.xlane.f32.xlu0 %v732_v13 }
 0x3ea   :  { %736 = vadd.xlane.f32.xlu1 %v735_v15 }
 0x3ec   :  { %739 = vadd.xlane.f32.xlu0 %v738_v23 }
 0x413   :  { %v1266_v25 = vpop.permute.xlu0 %1265 }
 0x414   :  { %v1289_v27 = vadd.f32 %v1266_v25, %v3282_v52  ;;  %v1290_v28 = vadd.f32 %v3275_v49, %v1266_v25  ;;  %v1268_v29 = vpop.permute.xlu1 %1267 }
 0x415   :  { %v1291_v30 = vadd.f32 %v1268_v29, %v3288_v54  ;;  %v1292_v31 = vadd.f32 %v3285_v53, %v1268_v29 }
 0x416   :  { %2772 = vtanh.f32 %v1289_v27 }
 0x417   :  { %2774 = vtanh.f32 %v1290_v28  ;;  %v1270_v2 = vpop.permute.xlu0 %1269 }
 0x418   :  { %2776 = vtanh.f32 %v1291_v30  ;;  %v1293_v32 = vadd.f32 %v1270_v2, %v3293_v56  ;;  %v1294_v33 = vadd.f32 %v3291_v55, %v1270_v2  ;;  %v1272_v34 = vpop.permute.xlu1 %1271  ;;  %v3371_v56 = vrot.slane %v3310_v63, %v3044_v18 }
 0x419   :  { %2778 = vtanh.f32 %v1292_v31  ;;  %v1296_v35 = vadd.f32 %v3295_v57, %v1272_v34  ;;  %v1295_v52 = vadd.f32 %v1272_v34, %v3297_v58 }
 0x41a   :  { %2780 = vtanh.f32 %v1293_v32 }
 0x41b   :  { %2782 = vtanh.f32 %v1294_v33  ;;  %v1274_v49 = vpop.permute.xlu0 %1273 }
 0x41c   :  { %2784 = vtanh.f32 %v1296_v35  ;;  %v1298_v53 = vadd.f32 %v3299_v59, %v1274_v49  ;;  %v1297_v54 = vadd.f32 %v1274_v49, %v3301_v60  ;;  %v1276_v36 = vpop.permute.xlu1 %1275 }
 0x41d   :  { %2786 = vtanh.f32 %v1295_v52  ;;  %v1300_v55 = vadd.f32 %v3303_v61, %v1276_v36  ;;  %v1299_v57 = vadd.f32 %v1276_v36, %v3305_v62 }
 0x41e   :  { %2788 = vtanh.f32 %v1298_v53 }
 0x41f   :  { %2790 = vtanh.f32 %v1297_v54  ;;  %v1278_v58 = vpop.permute.xlu0 %1277 }
 0x420   :  { %v2773_v37 = vpop.eup %2772  ;;  %2792 = vtanh.f32 %v1300_v55  ;;  %v1302_v38 = vadd.f32 %v3312_v0, %v1278_v58  ;;  %v1301_v59 = vadd.f32 %v1278_v58, %v3314_v1  ;;  %v1280_v60 = vpop.permute.xlu1 %1279 }
 0x421   :  { %v2775_v39 = vpop.eup %2774  ;;  %2794 = vtanh.f32 %v1299_v57  ;;  %v1304_v63 = vadd.f32 %v3320_v5, %v1280_v60  ;;  %v1303_v40 = vadd.f32 %v1280_v60, %v3322_v6  ;;  %v1325_v61 = vmul.f32 %v2773_v37, %v3371_v56 }
 0x422   :  { %v2777_v41 = vpop.eup %2776  ;;  %2796 = vtanh.f32 %v1302_v38  ;;  %v1326_v62 = vmul.f32 %v2775_v39, %v3371_v56 }
 0x423   :  { %v2779_v42 = vpop.eup %2778  ;;  %2798 = vtanh.f32 %v1301_v59  ;;  %v1341_v43 = vsel %vm68_vm1, %v1325_v61, 0.0  ;;  %v1327_v0 = vmul.f32 %v2777_v41, %v3371_v56  ;;  %v3412_v59 = vand.u32 127, %v64_v16 }
 0x424   :  { %v2781_v1 = vpop.eup %2780  ;;  %2800 = vtanh.f32 %v1304_v63  ;;  %v1344_v44 = vsel %vm68_vm1, %v1326_v62, 0.0  ;;  %1342 = vadd.xlane.f32.xlu1 %v1341_v43  ;;  %v1328_v5 = vmul.f32 %v2779_v42, %v3371_v56 }
 0x425   :  { %v2783_v6 = vpop.eup %2782  ;;  %2802 = vtanh.f32 %v1303_v40  ;;  %1345 = vadd.xlane.f32.xlu0 %v1344_v44  ;;  %v1329_v21 = vmul.f32 %v2781_v1, %v3371_v56  ;;  %v1347_v22 = vsel %vm68_vm1, %v1327_v0, 0.0  ;;  %v764_v39 = vadd.s32 4294967288, %v3412_v59 }
 0x426   :  { %v2785_v45 = vpop.eup %2784  ;;  %v1330_v20 = vmul.f32 %v2783_v6, %v3371_v56  ;;  %v1350_v50 = vsel %vm68_vm1, %v1328_v5, 0.0  ;;  %v3420_v62 = vsub.s32 %v3412_v59, %v3041_v17 }
 0x427   :  { %v2787_v46 = vpop.eup %2786  ;;  %v1332_v47 = vmul.f32 %v2785_v45, %v3371_v56  ;;  %v1353_v12 = vsel %vm68_vm1, %v1329_v21, 0.0  ;;  %v3416_v61 = vsub.s32 %v764_v39, %v3041_v17 }
 0x428   :  { %v2789_v48 = vpop.eup %2788  ;;  %1348 = vadd.xlane.f32.xlu1 %v1347_v22  ;;  %v1331_v51 = vmul.f32 %v2787_v46, %v3371_v56  ;;  %v1356_v15 = vsel %vm68_vm1, %v1330_v20, 0.0 }
 0x429   :  { %v2791_v4 = vpop.eup %2790  ;;  %1351 = vadd.xlane.f32.xlu0 %v1350_v50  ;;  %v1334_v7 = vmul.f32 %v2789_v48, %v3371_v56  ;;  %v1362_v35 = vsel %vm68_vm1, %v1332_v47, 0.0 }
 0x42a   :  { %v2793_v8 = vpop.eup %2792  ;;  %v1333_v9 = vmul.f32 %v2791_v4, %v3371_v56  ;;  %v1359_v34 = vsel %vm68_vm1, %v1331_v51, 0.0 }
 0x42b   :  { %v2795_v10 = vpop.eup %2794  ;;  %v1336_v13 = vmul.f32 %v2793_v8, %v3371_v56  ;;  %v1368_v32 = vsel %vm68_vm1, %v1334_v7, 0.0 }
 0x42c   :  { %v2797_v14 = vpop.eup %2796  ;;  %1354 = vadd.xlane.f32.xlu1 %v1353_v12  ;;  %v1335_v23 = vmul.f32 %v2795_v10, %v3371_v56  ;;  %v1365_v31 = vsel %vm68_vm1, %v1333_v9, 0.0 }
 0x42d   :  { %v2799_v25 = vpop.eup %2798  ;;  %1357 = vadd.xlane.f32.xlu0 %v1356_v15  ;;  %v1338_v27 = vmul.f32 %v2797_v14, %v3371_v56  ;;  %v1374_v49 = vsel %vm68_vm1, %v1336_v13, 0.0 }
 0x42e   :  { %v2801_v28 = vpop.eup %2800  ;;  %v1337_v29 = vmul.f32 %v2799_v25, %v3371_v56  ;;  %v1371_v52 = vsel %vm68_vm1, %v1335_v23, 0.0 }
 0x42f   :  { %v2803_v30 = vpop.eup %2802  ;;  %v1340_v2 = vmul.f32 %v2801_v28, %v3371_v56  ;;  %v1380_v54 = vsel %vm68_vm1, %v1338_v27, 0.0  ;;  %v3448_v28 = vld [vmem:[%s3926_s5] sm:$0xff] }
 0x430   :  { %1366 = vadd.xlane.f32.xlu1 %v1365_v31  ;;  %v1339_v33 = vmul.f32 %v2803_v30, %v3371_v56  ;;  %v1377_v53 = vsel %vm68_vm1, %v1337_v29, 0.0  ;;  %vm741_vm11 = vcmp.gt.f32.partialorder %v3448_v28, 0.0 }
 0x431   :  { %1369 = vadd.xlane.f32.xlu0 %v1368_v32  ;;  %v1386_v56 = vsel %vm68_vm1, %v1340_v2, 0.0 }
 0x432   :  { %v1383_v36 = vsel %vm68_vm1, %v1339_v33, 0.0 }
 0x434   :  { %1360 = vadd.xlane.f32.xlu1 %v1359_v34 }
 0x435   :  { %1363 = vadd.xlane.f32.xlu0 %v1362_v35 }
 0x438   :  { %1372 = vadd.xlane.f32.xlu1 %v1371_v52 }
 0x439   :  { %1375 = vadd.xlane.f32.xlu0 %v1374_v49 }
 0x43c   :  { %1378 = vadd.xlane.f32.xlu1 %v1377_v53 }
 0x43d   :  { %1381 = vadd.xlane.f32.xlu0 %v1380_v54 }
 0x440   :  { %1384 = vadd.xlane.f32.xlu1 %v1383_v36 }
 0x441   :  { %1387 = vadd.xlane.f32.xlu0 %v1386_v56 }
 0x459   :  { %v695_v55 = vpop.xlane.xlu0 %694 }
 0x45a   :  { %v763_v5 = vrot.slane %v695_v55, %v3420_v62 }
 0x45d   :  { %v701_v57 = vpop.xlane.xlu0 %700 }
 0x45e   :  { %v774_v6 = vrot.slane %v701_v57, %v3420_v62 }
 0x45f   :  { %v698_v58 = vpop.xlane.xlu1 %697 }
 0x460   :  { %v768_v43 = vrot.slane %v698_v58, %v3416_v61 }
 0x461   :  { %v704_v37 = vpop.xlane.xlu0 %703 }
 0x462   :  { %v778_v0 = vrot.slane %v704_v37, %v3416_v61  ;;  %v770_v46 = vsel %vm769_vm3, %v768_v43, %v763_v5 }
 0x463   :  { %v707_v38 = vpop.xlane.xlu1 %706 }
 0x464   :  { %v783_v16 = vrot.slane %v707_v38, %v3420_v62  ;;  %v779_v22 = vsel %vm769_vm3, %v778_v0, %v774_v6 }
 0x465   :  { %v710_v60 = vpop.xlane.xlu0 %709  ;;  %v835_v7 = vsel %vm834_vm4, %v779_v22, %v770_v46 }
 0x466   :  { %v787_v1 = vrot.slane %v710_v60, %v3416_v61 }
 0x467   :  { %v719_v63 = vpop.xlane.xlu1 %718 }
 0x468   :  { %v788_v47 = vsel %vm769_vm3, %v787_v1, %v783_v16  ;;  %v801_v8 = vrot.slane %v719_v63, %v3420_v62 }
 0x469   :  { %v722_v40 = vpop.xlane.xlu0 %721  ;;  %v837_v13 = vsel %vm836_vm5, %v788_v47, %v835_v7 }
 0x46a   :  { %v805_v9 = vrot.slane %v722_v40, %v3416_v61 }
 0x46b   :  { %v713_v41 = vpop.xlane.xlu1 %712 }
 0x46c   :  { %v792_v21 = vrot.slane %v713_v41, %v3420_v62  ;;  %v806_v29 = vsel %vm769_vm3, %v805_v9, %v801_v8 }
 0x46d   :  { %v716_v42 = vpop.xlane.xlu0 %715 }
 0x46e   :  { %v796_v45 = vrot.slane %v716_v42, %v3416_v61 }
 0x46f   :  { %v725_v44 = vpop.xlane.xlu1 %724 }
 0x470   :  { %v797_v50 = vsel %vm769_vm3, %v796_v45, %v792_v21  ;;  %v810_v51 = vrot.slane %v725_v44, %v3420_v62 }
 0x471   :  { %v728_v20 = vpop.xlane.xlu0 %727  ;;  %v839_v15 = vsel %vm838_vm6, %v797_v50, %v837_v13 }
 0x472   :  { %v814_v4 = vrot.slane %v728_v20, %v3416_v61  ;;  %v841_v32 = vsel %vm840_vm7, %v806_v29, %v839_v15 }
 0x473   :  { %v731_v48 = vpop.xlane.xlu1 %730 }
 0x474   :  { %v819_v10 = vrot.slane %v731_v48, %v3420_v62  ;;  %v815_v25 = vsel %vm769_vm3, %v814_v4, %v810_v51 }
 0x475   :  { %v734_v12 = vpop.xlane.xlu0 %733  ;;  %v843_v33 = vsel %vm3939_vm8, %v815_v25, %v841_v32 }
 0x476   :  { %v823_v14 = vrot.slane %v734_v12, %v3416_v61 }
 0x477   :  { %v737_v23 = vpop.xlane.xlu1 %736 }
 0x478   :  { %v828_v27 = vrot.slane %v737_v23, %v3420_v62  ;;  %v824_v30 = vsel %vm769_vm3, %v823_v14, %v819_v10 }
 0x479   :  { %v740_v31 = vpop.xlane.xlu0 %739  ;;  %v845_v35 = vsel %vm3938_vm9, %v824_v30, %v843_v33 }
 0x47a   :  { %v832_v2 = vrot.slane %v740_v31, %v3416_v61 }
 0x47c   :  { %v833_v34 = vsel %vm769_vm3, %v832_v2, %v828_v27 }
 0x47d   :  { %v847_v52 = vsel %vm3937_vm10, %v833_v34, %v845_v35 }
 0x47e   :  { %v849_v49 = vsel %vm741_vm11, %v847_v52, -1e+30 }
 0x47f   :  { %v851_v53 = vsel %vm850_vm12, %v849_v49, -inf }
 0x480   :  { %852 = vmax.xlane.f32.xlu1 %v851_v53 }
 0x4b1   :  { %v1343_v54 = vpop.xlane.xlu1 %1342 }
 0x4b2   :  { %v1346_v36 = vpop.xlane.xlu0 %1345  ;;  %v1408_v0 = vrot.slane %v1343_v54, %v3420_v62 }
 0x4b3   :  { %v1412_v43 = vrot.slane %v1346_v36, %v3416_v61  ;;  %v3499_v36 = vsub.s32 3, %v3041_v17 }
 0x4b5   :  { %v1349_v56 = vpop.xlane.xlu1 %1348  ;;  %v1413_v45 = vsel %vm769_vm3, %v1412_v43, %v1408_v0  ;;  %v3516_v43 = vsub.s32 2, %v3041_v17 }
 0x4b6   :  { %v1352_v55 = vpop.xlane.xlu0 %1351  ;;  %v1417_v40 = vrot.slane %v1349_v56, %v3420_v62  ;;  %v3504_v56 = vld [vmem:[%s3932_s11] sm:$0xff] }
 0x4b7   :  { %v1421_v63 = vrot.slane %v1352_v55, %v3416_v61  ;;  %v1766_v55 = vrot.slane %v3504_v56, %v3499_v36 }
 0x4b9   :  { %v1355_v57 = vpop.xlane.xlu1 %1354  ;;  %v1422_v6 = vsel %vm769_vm3, %v1421_v63, %v1417_v40 }
 0x4ba   :  { %v1358_v58 = vpop.xlane.xlu0 %1357  ;;  %v1426_v42 = vrot.slane %v1355_v57, %v3420_v62  ;;  %v1477_v48 = vsel %vm834_vm4, %v1422_v6, %v1413_v45 }
 0x4bb   :  { %v1430_v41 = vrot.slane %v1358_v58, %v3416_v61 }
 0x4bd   :  { %v1367_v37 = vpop.xlane.xlu1 %1366  ;;  %v1431_v21 = vsel %vm769_vm3, %v1430_v41, %v1426_v42 }
 0x4be   :  { %v1370_v38 = vpop.xlane.xlu0 %1369  ;;  %v1444_v51 = vrot.slane %v1367_v37, %v3420_v62  ;;  %v1478_v8 = vsel %vm836_vm5, %v1431_v21, %v1477_v48  ;;  %v3535_v21 = vsub.s32 6, %v3041_v17 }
 0x4bf   :  { %v1448_v50 = vrot.slane %v1370_v38, %v3416_v61 }
 0x4c1   :  { %v1361_v60 = vpop.xlane.xlu1 %1360  ;;  %v1449_v14 = vsel %vm769_vm3, %v1448_v50, %v1444_v51 }
 0x4c2   :  { %v1364_v39 = vpop.xlane.xlu0 %1363  ;;  %v1435_v1 = vrot.slane %v1361_v60, %v3420_v62 }
 0x4c3   :  { %v1439_v16 = vrot.slane %v1364_v39, %v3416_v61 }
 0x4c5   :  { %v1373_v44 = vpop.xlane.xlu1 %1372  ;;  %v1440_v20 = vsel %vm769_vm3, %v1439_v16, %v1435_v1  ;;  %v3525_v1 = vsub.s32 4, %v3041_v17 }
 0x4c6   :  { %v1376_v5 = vpop.xlane.xlu0 %1375  ;;  %v1453_v22 = vrot.slane %v1373_v44, %v3420_v62  ;;  %v1479_v10 = vsel %vm838_vm6, %v1440_v20, %v1478_v8  ;;  %v3540_v20 = vsub.s32 7, %v3041_v17 }
 0x4c7   :  { %v1457_v46 = vrot.slane %v1376_v5, %v3416_v61  ;;  %v1480_v29 = vsel %vm840_vm7, %v1449_v14, %v1479_v10  ;;  %v3530_v5 = vsub.s32 5, %v3041_v17 }
 0x4c9   :  { %v1379_v47 = vpop.xlane.xlu1 %1378  ;;  %v1458_v12 = vsel %vm769_vm3, %v1457_v46, %v1453_v22 }
 0x4ca   :  { %v1382_v4 = vpop.xlane.xlu0 %1381  ;;  %v1462_v7 = vrot.slane %v1379_v47, %v3420_v62  ;;  %v1481_v30 = vsel %vm3939_vm8, %v1458_v12, %v1480_v29  ;;  %v2825_v29 = vld [vmem:[%s3924_s3 + $0x18] sm:$0xff] }
 0x4cb   :  { %v1466_v9 = vrot.slane %v1382_v4, %v3416_v61 }
 0x4cd   :  { %v1385_v13 = vpop.xlane.xlu1 %1384  ;;  %v1467_v15 = vsel %vm769_vm3, %v1466_v9, %v1462_v7 }
 0x4ce   :  { %v1388_v23 = vpop.xlane.xlu0 %1387  ;;  %v1471_v25 = vrot.slane %v1385_v13, %v3420_v62  ;;  %v1482_v2 = vsel %vm3938_vm9, %v1467_v15, %v1481_v30 }
 0x4cf   :  { %v1475_v27 = vrot.slane %v1388_v23, %v3416_v61 }
 0x4d1   :  { %v1476_v31 = vsel %vm769_vm3, %v1475_v27, %v1471_v25  ;;  %v2824_v25 = vld [vmem:[%s3924_s3 + $0x10] sm:$0xff] }
 0x4d2   :  { %v1483_v32 = vsel %vm3937_vm10, %v1476_v31, %v1482_v2 }
 0x4d3   :  { %v1485_v33 = vsel %vm741_vm11, %v1483_v32, -1e+30 }
 0x4d4   :  { %v1486_v34 = vsel %vm850_vm12, %v1485_v33, -inf }
 0x4d5   :  { %1487 = vmax.xlane.f32.xlu0 %v1486_v34 }
 0x50d   :  { %v853_v35 = vpop.xlane.xlu1 %852 }
 0x50e   :  { %v854_v62 = vsub.f32 %v849_v49, %v853_v35  ;;  %v2826_v35 = vld [vmem:[%s3924_s3 + $0x28] sm:$0xff] }
 0x510   :  { %v855_v52 = vmul.f32 1.442695, %v854_v62 }
 0x512   :  { %2804 = vpow2.f32 %v855_v52  ;;  %v2827_v52 = vld [vmem:[%s3924_s3 + $0x20] sm:$0xff] }
 0x51c   :  { %v2805_v61 = vpop.eup %2804 }
 0x51d   :  { %v857_v53 = vmul.f32 %v2805_v61, %v3448_v28 }
 0x51f   :  { %v858_v54 = vsel %vm850_vm12, %v857_v53, 0.0 }
 0x520   :  { %859 = vadd.xlane.f32.xlu1 %v858_v54 }
 0x531   :  { %1768 = vrot.lane.b32.xlu1 %v1766_v55, %s2911_s28 }
 0x562   :  { %v1488_v49 = vpop.xlane.xlu0 %1487 }
 0x563   :  { %v1489_v57 = vsub.f32 %v1485_v33, %v1488_v49 }
 0x565   :  { %v1490_v58 = vmul.f32 1.442695, %v1489_v57 }
 0x567   :  { %2806 = vpow2.f32 %v1490_v58 }
 0x571   :  { %v2807_v37 = vpop.eup %2806 }
 0x572   :  { %v1492_v38 = vmul.f32 %v2807_v37, %v3448_v28 }
 0x574   :  { %v1493_v60 = vsel %vm850_vm12, %v1492_v38, 0.0 }
 0x575   :  { %1494 = vadd.xlane.f32.xlu0 %v1493_v60 }
 0x5ad   :  { %v860_v39 = vpop.xlane.xlu1 %859 }
 0x5ae   :  { %v861_v63 = vmax.f32 %v860_v39, 1e-20  ;;  %v2829_v39 = vld [vmem:[%s3924_s3] sm:$0xff] }
 0x5b0   :  { %2808 = vrcp.f32 %v861_v63 }
 0x5b1   :  { %v1769_v12 = vpop.permute.xlu1 %1768 }
 0x5b2   :  { %v1771_v23 = vmul.f32 %v1769_v12, %v3172_v19 }
 0x5ba   :  { %v2809_v40 = vpop.eup %2808 }
 0x5bb   :  { %v3511_v41 = vmul.f32 %v2809_v40, %v857_v53 }
 0x5bd   :  { %v878_v42 = vrot.slane %v3511_v41, %v3044_v18  ;;  %v889_v28 = vrot.slane %v3511_v41, %v3516_v43  ;;  %v867_v0 = vrot.slane %v3511_v41, %v3052_v26  ;;  %v900_v16 = vrot.slane %v3511_v41, %v3499_v36 }
 0x5be   :  { %v911_v44 = vrot.slane %v3511_v41, %v3525_v1  ;;  %v922_v6 = vrot.slane %v3511_v41, %v3530_v5  ;;  %v933_v45 = vrot.slane %v3511_v41, %v3535_v21  ;;  %v944_v46 = vrot.slane %v3511_v41, %v3540_v20 }
 0x5bf   :  { %884 = vbcast.lane.b32.xlu1 %v878_v42, 264  ;;  %880 = vbcast.lane.b32.xlu0 %v878_v42, 256 }
 0x5c3   :  { %891 = vbcast.lane.b32.xlu1 %v889_v28, 256  ;;  %895 = vbcast.lane.b32.xlu0 %v889_v28, 264 }
 0x5c7   :  { %873 = vbcast.lane.b32.xlu0 %v867_v0, 264  ;;  %869 = vbcast.lane.b32.xlu1 %v867_v0, 256 }
 0x5cb   :  { %906 = vbcast.lane.b32.xlu0 %v900_v16, 264  ;;  %902 = vbcast.lane.b32.xlu1 %v900_v16, 256 }
 0x5cf   :  { %917 = vbcast.lane.b32.xlu0 %v911_v44, 264  ;;  %913 = vbcast.lane.b32.xlu1 %v911_v44, 256 }
 0x5d3   :  { %928 = vbcast.lane.b32.xlu0 %v922_v6, 264  ;;  %924 = vbcast.lane.b32.xlu1 %v922_v6, 256 }
 0x5d7   :  { %939 = vbcast.lane.b32.xlu0 %v933_v45, 264  ;;  %935 = vbcast.lane.b32.xlu1 %v933_v45, 256 }
 0x5db   :  { %950 = vbcast.lane.b32.xlu0 %v944_v46, 264  ;;  %946 = vbcast.lane.b32.xlu1 %v944_v46, 256  ;;  %v2830_v46 = vld [vmem:[%s3924_s3 + $0x38] sm:$0xff] }
 0x602   :  { %v1495_v22 = vpop.xlane.xlu0 %1494 }
 0x603   :  { %v1496_v47 = vmax.f32 %v1495_v22, 1e-20 }
 0x605   :  { %2810 = vrcp.f32 %v1496_v47  ;;  %v2831_v47 = vld [vmem:[%s3924_s3 + $0x30] sm:$0xff] }
 0x60f   :  { %v2811_v48 = vpop.eup %2810 }
 0x610   :  { %v1498_v50 = vmul.f32 %v2811_v48, %v1492_v38  ;;  %v2828_v38 = vld [vmem:[%s3924_s3 + $0x8] sm:$0xff] }
 0x612   :  { %v1513_v51 = vrot.slane %v1498_v50, %v3044_v18  ;;  %v1524_v4 = vrot.slane %v1498_v50, %v3516_v43  ;;  %v1502_v17 = vrot.slane %v1498_v50, %v3052_v26  ;;  %v1535_v7 = vrot.slane %v1498_v50, %v3499_v36 }
 0x613   :  { %v1546_v8 = vrot.slane %v1498_v50, %v3525_v1  ;;  %v1557_v9 = vrot.slane %v1498_v50, %v3530_v5  ;;  %v1568_v10 = vrot.slane %v1498_v50, %v3535_v21  ;;  %v1579_v13 = vrot.slane %v1498_v50, %v3540_v20 }
 0x614   :  { %1519 = vbcast.lane.b32.xlu0 %v1513_v51, 264  ;;  %1515 = vbcast.lane.b32.xlu1 %v1513_v51, 256 }
 0x618   :  { %1530 = vbcast.lane.b32.xlu0 %v1524_v4, 264  ;;  %1526 = vbcast.lane.b32.xlu1 %v1524_v4, 256 }
 0x61c   :  { %1508 = vbcast.lane.b32.xlu0 %v1502_v17, 264  ;;  %1504 = vbcast.lane.b32.xlu1 %v1502_v17, 256 }
 0x620   :  { %1541 = vbcast.lane.b32.xlu0 %v1535_v7, 264  ;;  %1537 = vbcast.lane.b32.xlu1 %v1535_v7, 256 }
 0x624   :  { %1552 = vbcast.lane.b32.xlu0 %v1546_v8, 264  ;;  %1548 = vbcast.lane.b32.xlu1 %v1546_v8, 256 }
 0x628   :  { %1563 = vbcast.lane.b32.xlu0 %v1557_v9, 264  ;;  %1559 = vbcast.lane.b32.xlu1 %v1557_v9, 256 }
 0x62c   :  { %1574 = vbcast.lane.b32.xlu0 %v1568_v10, 264  ;;  %1570 = vbcast.lane.b32.xlu1 %v1568_v10, 256 }
 0x630   :  { %1585 = vbcast.lane.b32.xlu0 %v1579_v13, 264  ;;  %1581 = vbcast.lane.b32.xlu1 %v1579_v13, 256 }
 0x631   :  { %v881_v14 = vpop.permute.xlu0 %880  ;;  %v885_v15 = vpop.permute.xlu1 %884 }
 0x632   :  { %v954_v27 = vmul.f32 %v2824_v25, %v881_v14  ;;  %v955_v30 = vmul.f32 %v2825_v29, %v885_v15  ;;  %v2832_v14 = vld [vmem:[%s3924_s3 + $0x48] sm:$0xff] }
 0x634   :  { %v977_v31 = vsel %vm68_vm1, %v954_v27, 0.0  ;;  %v978_v2 = vsel %vm68_vm1, %v955_v30, 0.0  ;;  %1773 = vrot.lane.b32.xlu1 %v1771_v23, %s2910_s19  ;;  %v2833_v23 = vld [vmem:[%s3924_s3 + $0x40] sm:$0xff] }
 0x635   :  { %v979_v32 = vadd.f32 %v978_v2, %v977_v31  ;;  %v896_v33 = vpop.permute.xlu0 %895  ;;  %v892_v34 = vpop.permute.xlu1 %891 }
 0x636   :  { %v957_v62 = vmul.f32 %v2826_v35, %v896_v33  ;;  %v956_v61 = vmul.f32 %v2827_v52, %v892_v34 }
 0x637   :  { %v980_v53 = vrot.slane %v979_v32, 4 }
 0x638   :  { %v987_v54 = vsel %vm68_vm1, %v957_v62, 0.0  ;;  %v986_v55 = vsel %vm68_vm1, %v956_v61, 0.0  ;;  %v2834_v61 = vld [vmem:[%s3924_s3 + $0x58] sm:$0xff] }
 0x639   :  { %v981_v49 = vadd.f32 %v980_v53, %v979_v32  ;;  %v988_v57 = vadd.f32 %v987_v54, %v986_v55  ;;  %v874_v58 = vpop.permute.xlu0 %873  ;;  %v870_v37 = vpop.permute.xlu1 %869  ;;  %v2835_v54 = vld [vmem:[%s3924_s3 + $0x50] sm:$0xff] }
 0x63a   :  { %v953_v60 = vmul.f32 %v2828_v38, %v874_v58  ;;  %v952_v63 = vmul.f32 %v2829_v39, %v870_v37 }
 0x63b   :  { %v989_v40 = vrot.slane %v988_v57, 4  ;;  %v982_v0 = vrot.slane %v981_v49, 2 }
 0x63c   :  { %v969_v42 = vsel %vm68_vm1, %v953_v60, 0.0  ;;  %v968_v28 = vsel %vm68_vm1, %v952_v63, 0.0 }
 0x63d   :  { %v990_v16 = vadd.f32 %v989_v40, %v988_v57  ;;  %v970_v44 = vadd.f32 %v969_v42, %v968_v28  ;;  %v907_v6 = vpop.permute.xlu0 %906  ;;  %v903_v45 = vpop.permute.xlu1 %902  ;;  %v983_v7 = vadd.f32 %v982_v0, %v981_v49 }
 0x63e   :  { %v959_v22 = vmul.f32 %v2830_v46, %v907_v6  ;;  %v958_v48 = vmul.f32 %v2831_v47, %v903_v45  ;;  %v2837_v45 = vld [vmem:[%s3924_s3 + $0x60] sm:$0xff] }
 0x63f   :  { %v991_v50 = vrot.slane %v990_v16, 2  ;;  %v971_v51 = vrot.slane %v970_v44, 4  ;;  %v984_v2 = vrot.slane %v983_v7, 1 }
 0x640   :  { %v996_v4 = vsel %vm68_vm1, %v959_v22, 0.0  ;;  %v995_v17 = vsel %vm68_vm1, %v958_v48, 0.0 }
 0x641   :  { %v972_v8 = vadd.f32 %v971_v51, %v970_v44  ;;  %v997_v9 = vadd.f32 %v996_v4, %v995_v17  ;;  %v918_v10 = vpop.permute.xlu0 %917  ;;  %v914_v12 = vpop.permute.xlu1 %913  ;;  %v992_v13 = vadd.f32 %v991_v50, %v990_v16  ;;  %v985_v60 = vadd.f32 %v984_v2, %v983_v7  ;;  %v2836_v44 = vld [vmem:[%s3924_s3 + $0x68] sm:$0xff] }
 0x642   :  { %v961_v15 = vmul.f32 %v2832_v14, %v918_v10  ;;  %v960_v25 = vmul.f32 %v2833_v23, %v914_v12  ;;  %v2838_v14 = vld [vmem:[%s3924_s3 + $0x78] sm:$0xff]  ;;  %v2839_v23 = vld [vmem:[%s3924_s3 + $0x70] sm:$0xff] }
 0x643   :  { %v973_v27 = vrot.slane %v972_v8, 2  ;;  %v998_v29 = vrot.slane %v997_v9, 4  ;;  %v993_v62 = vrot.slane %v992_v13, 1 }
 0x644   :  { %v1005_v30 = vsel %vm68_vm1, %v961_v15, 0.0  ;;  %v1004_v31 = vsel %vm68_vm1, %v960_v25, 0.0 }
 0x645   :  { %v974_v32 = vadd.f32 %v973_v27, %v972_v8  ;;  %v999_v33 = vadd.f32 %v998_v29, %v997_v9  ;;  %v929_v34 = vpop.permute.xlu0 %928  ;;  %v925_v35 = vpop.permute.xlu1 %924  ;;  %v1006_v52 = vadd.f32 %v1005_v30, %v1004_v31  ;;  %v994_v0 = vadd.f32 %v993_v62, %v992_v13 }
 0x646   :  { %v963_v53 = vmul.f32 %v2834_v61, %v929_v34  ;;  %v962_v55 = vmul.f32 %v2835_v54, %v925_v35  ;;  %v1680_v31 = vrot.slane %v3504_v56, %v3052_v26 }
 0x647   :  { %v975_v49 = vrot.slane %v974_v32, 1  ;;  %v1000_v57 = vrot.slane %v999_v33, 2  ;;  %v1007_v58 = vrot.slane %v1006_v52, 4 }
 0x648   :  { %v1014_v37 = vsel %vm68_vm1, %v963_v53, 0.0  ;;  %v1013_v38 = vsel %vm68_vm1, %v962_v55, 0.0  ;;  %v1682_v55 = vmul.f32 %v1680_v31, %v985_v60 }
 0x649   :  { %v976_v39 = vadd.f32 %v975_v49, %v974_v32  ;;  %v1001_v63 = vadd.f32 %v1000_v57, %v999_v33  ;;  %v1015_v40 = vadd.f32 %v1014_v37, %v1013_v38  ;;  %v940_v42 = vpop.permute.xlu0 %939  ;;  %v936_v28 = vpop.permute.xlu1 %935  ;;  %v1008_v16 = vadd.f32 %v1007_v58, %v1006_v52 }
 0x64a   :  { %v965_v6 = vmul.f32 %v2836_v44, %v940_v42  ;;  %v964_v46 = vmul.f32 %v2837_v45, %v936_v28  ;;  %v1683_v44 = vmul.f32 %v1680_v31, %v994_v0 }
 0x64b   :  { %v1803_v22 = vsel %vm834_vm4, %v985_v60, %v976_v39  ;;  %v1002_v47 = vrot.slane %v1001_v63, 1  ;;  %v1016_v48 = vrot.slane %v1015_v40, 4  ;;  %v1009_v51 = vrot.slane %v1008_v16, 2 }
 0x64c   :  { %v1804_v50 = vsel %vm836_vm5, %v994_v0, %v1803_v22  ;;  %v1023_v4 = vsel %vm68_vm1, %v965_v6, 0.0  ;;  %v1022_v17 = vsel %vm68_vm1, %v964_v46, 0.0  ;;  %v1681_v38 = vmul.f32 %v1680_v31, %v976_v39 }
 0x64d   :  { %v1003_v7 = vadd.f32 %v1002_v47, %v1001_v63  ;;  %v1017_v8 = vadd.f32 %v1016_v48, %v1015_v40  ;;  %v1024_v9 = vadd.f32 %v1023_v4, %v1022_v17  ;;  %v951_v10 = vpop.permute.xlu0 %950  ;;  %v947_v12 = vpop.permute.xlu1 %946  ;;  %v1010_v13 = vadd.f32 %v1009_v51, %v1008_v16 }
 0x64e   :  { %v967_v15 = vmul.f32 %v2838_v14, %v951_v10  ;;  %v966_v25 = vmul.f32 %v2839_v23, %v947_v12  ;;  %v1697_v16 = vrot.slane %v1682_v55, 7  ;;  %v1699_v4 = vrot.slane %v1683_v44, 6 }
 0x64f   :  { %v1805_v27 = vsel %vm838_vm6, %v1003_v7, %v1804_v50  ;;  %v1018_v29 = vrot.slane %v1017_v8, 2  ;;  %v1025_v30 = vrot.slane %v1024_v9, 4  ;;  %v1011_v2 = vrot.slane %v1010_v13, 1 }
 0x650   :  { %v1032_v32 = vsel %vm68_vm1, %v967_v15, 0.0  ;;  %v1031_v33 = vsel %vm68_vm1, %v966_v25, 0.0  ;;  %v1684_v63 = vmul.f32 %v1680_v31, %v1003_v7  ;;  %v1698_v47 = vsel %vm834_vm4, %v1697_v16, %v1681_v38 }
 0x651   :  { %v1019_v34 = vadd.f32 %v1018_v29, %v1017_v8  ;;  %v1026_v35 = vadd.f32 %v1025_v30, %v1024_v9  ;;  %v1033_v62 = vadd.f32 %v1032_v32, %v1031_v33  ;;  %v1012_v52 = vadd.f32 %v1011_v2, %v1010_v13 }
 0x652   :  { %v1701_v60 = vrot.slane %v1684_v63, 5  ;;  %v1700_v8 = vsel %vm836_vm5, %v1699_v4, %v1698_v47  ;;  %v1757_v0 = vrot.slane %v3504_v56, %v3516_v43 }
 0x653   :  { %v1020_v61 = vrot.slane %v1019_v34, 1  ;;  %v1027_v53 = vrot.slane %v1026_v35, 2  ;;  %v1034_v54 = vrot.slane %v1033_v62, 4  ;;  %v1806_v49 = vsel %vm840_vm7, %v1012_v52, %v1805_v27  ;;  %v3640_v27 = vld [vmem:[%s3922_s1] sm:$0xff] }
 0x654   :  { %v1685_v6 = vmul.f32 %v1680_v31, %v1012_v52  ;;  %v1702_v12 = vsel %vm838_vm6, %v1701_v60, %v1700_v8  ;;  %v1758_v29 = vmul.f32 %v3640_v27, %v1757_v0  ;;  %v2847_v8 = vld [vmem:[%s3925_s4 + $0x38] sm:$0xff]  ;;  %v2848_v0 = vld [vmem:[%s3925_s4 + $0x30] sm:$0xff] }
 0x655   :  { %v1021_v57 = vadd.f32 %v1020_v61, %v1019_v34  ;;  %v1028_v58 = vadd.f32 %v1027_v53, %v1026_v35  ;;  %v1035_v37 = vadd.f32 %v1034_v54, %v1033_v62  ;;  %v2841_v34 = vld [vmem:[%s3925_s4 + $0x18] sm:$0xff]  ;;  %v2842_v62 = vld [vmem:[%s3925_s4 + $0x10] sm:$0xff] }
 0x656   :  { %v1703_v39 = vrot.slane %v1685_v6, 4  ;;  %v1759_v2 = vsel %vm850_vm12, %v1758_v29, 0.0 }
 0x657   :  { %v1807_v40 = vsel %vm3939_vm8, %v1021_v57, %v1806_v49  ;;  %v1029_v42 = vrot.slane %v1028_v58, 1  ;;  %v1036_v28 = vrot.slane %v1035_v37, 2  ;;  %v1686_v22 = vmul.f32 %v1680_v31, %v1021_v57  ;;  %v2843_v57 = vld [vmem:[%s3925_s4 + $0x28] sm:$0xff] }
 0x658   :  { %v1704_v14 = vsel %vm840_vm7, %v1703_v39, %v1702_v12 }
 0x659   :  { %v1030_v45 = vadd.f32 %v1029_v42, %v1028_v58  ;;  %v1037_v46 = vadd.f32 %v1036_v28, %v1035_v37  ;;  %v1705_v7 = vrot.slane %v1686_v22, 3  ;;  %v2844_v37 = vld [vmem:[%s3925_s4 + $0x20] sm:$0xff] }
 0x65a   :  { %v2846_v22 = vld [vmem:[%s3925_s4] sm:$0xff] }
 0x65b   :  { %v1038_v48 = vrot.slane %v1037_v46, 1  ;;  %v1687_v50 = vmul.f32 %v1680_v31, %v1030_v45  ;;  %v1808_v51 = vsel %vm3938_vm9, %v1030_v45, %v1807_v40  ;;  %v1706_v15 = vsel %vm3939_vm8, %v1705_v7, %v1704_v14  ;;  %v2845_v45 = vld [vmem:[%s3925_s4 + $0x8] sm:$0xff] }
 0x65d   :  { %v1039_v17 = vadd.f32 %v1038_v48, %v1037_v46  ;;  %v1707_v9 = vrot.slane %v1687_v50, 2 }
 0x65f   :  { %v1688_v10 = vmul.f32 %v1680_v31, %v1039_v17  ;;  %v3632_v13 = vsel %vm3937_vm10, %v1039_v17, %v1808_v51  ;;  %v1708_v25 = vsel %vm3938_vm9, %v1707_v9, %v1706_v15 }
 0x661   :  { %v1709_v23 = vrot.slane %v1688_v10, 1 }
 0x663   :  { %v1710_v30 = vsel %vm3937_vm10, %v1709_v23, %v1708_v25 }
 0x664   :  { %v1712_v31 = vsel %vm68_vm1, %v1710_v30, 0.0 }
 0x665   :  { %1713 = vadd.xlane.f32.xlu0 %v1712_v31 }
 0x669   :  { %1760 = vadd.xlane.f32.xlu0 %v1759_v2 }
 0x686   :  { %v1520_v32 = vpop.permute.xlu0 %1519  ;;  %v1516_v33 = vpop.permute.xlu1 %1515 }
 0x687   :  { %v1590_v35 = vmul.f32 %v2841_v34, %v1520_v32  ;;  %v1589_v52 = vmul.f32 %v2842_v62, %v1516_v33  ;;  %v2849_v33 = vld [vmem:[%s3925_s4 + $0x48] sm:$0xff] }
 0x689   :  { %v1613_v61 = vsel %vm68_vm1, %v1590_v35, 0.0  ;;  %v1612_v53 = vsel %vm68_vm1, %v1589_v52, 0.0  ;;  %v2850_v35 = vld [vmem:[%s3925_s4 + $0x40] sm:$0xff] }
 0x68a   :  { %v1614_v54 = vadd.f32 %v1613_v61, %v1612_v53  ;;  %v1531_v55 = vpop.permute.xlu0 %1530  ;;  %v1527_v49 = vpop.permute.xlu1 %1526 }
 0x68b   :  { %v1592_v58 = vmul.f32 %v2843_v57, %v1531_v55  ;;  %v1591_v38 = vmul.f32 %v2844_v37, %v1527_v49 }
 0x68c   :  { %v1615_v63 = vrot.slane %v1614_v54, 4 }
 0x68d   :  { %v1622_v40 = vsel %vm68_vm1, %v1592_v58, 0.0  ;;  %v1621_v42 = vsel %vm68_vm1, %v1591_v38, 0.0 }
 0x68e   :  { %v1616_v28 = vadd.f32 %v1615_v63, %v1614_v54  ;;  %v1623_v16 = vadd.f32 %v1622_v40, %v1621_v42  ;;  %v1509_v44 = vpop.permute.xlu0 %1508  ;;  %v1505_v6 = vpop.permute.xlu1 %1504  ;;  %v2851_v40 = vld [vmem:[%s3925_s4 + $0x58] sm:$0xff] }
 0x68f   :  { %v1588_v46 = vmul.f32 %v2845_v45, %v1509_v44  ;;  %v1587_v47 = vmul.f32 %v2846_v22, %v1505_v6 }
 0x690   :  { %v1624_v60 = vrot.slane %v1623_v16, 4  ;;  %v1617_v51 = vrot.slane %v1616_v28, 2 }
 0x691   :  { %v1604_v48 = vsel %vm68_vm1, %v1588_v46, 0.0  ;;  %v1603_v50 = vsel %vm68_vm1, %v1587_v47, 0.0 }
 0x692   :  { %v1625_v4 = vadd.f32 %v1624_v60, %v1623_v16  ;;  %v1605_v39 = vadd.f32 %v1604_v48, %v1603_v50  ;;  %v1542_v17 = vpop.permute.xlu0 %1541  ;;  %v1538_v7 = vpop.permute.xlu1 %1537  ;;  %v1618_v25 = vadd.f32 %v1617_v51, %v1616_v28  ;;  %v2852_v28 = vld [vmem:[%s3925_s4 + $0x50] sm:$0xff] }
 0x693   :  { %v1594_v9 = vmul.f32 %v2847_v8, %v1542_v17  ;;  %v1593_v10 = vmul.f32 %v2848_v0, %v1538_v7  ;;  %v2853_v7 = vld [vmem:[%s3925_s4 + $0x68] sm:$0xff] }
 0x694   :  { %v1626_v12 = vrot.slane %v1625_v4, 2  ;;  %v1606_v14 = vrot.slane %v1605_v39, 4  ;;  %v1619_v55 = vrot.slane %v1618_v25, 1 }
 0x695   :  { %v1631_v15 = vsel %vm68_vm1, %v1594_v9, 0.0  ;;  %v1630_v23 = vsel %vm68_vm1, %v1593_v10, 0.0  ;;  %v2854_v9 = vld [vmem:[%s3925_s4 + $0x60] sm:$0xff] }
 0x696   :  { %v1607_v29 = vadd.f32 %v1606_v14, %v1605_v39  ;;  %v1632_v30 = vadd.f32 %v1631_v15, %v1630_v23  ;;  %v1553_v31 = vpop.permute.xlu0 %1552  ;;  %v1549_v2 = vpop.permute.xlu1 %1548  ;;  %v1627_v32 = vadd.f32 %v1626_v12, %v1625_v4  ;;  %v1620_v47 = vadd.f32 %v1619_v55, %v1618_v25 }
 0x697   :  { %v1596_v34 = vmul.f32 %v2849_v33, %v1553_v31  ;;  %v1595_v62 = vmul.f32 %v2850_v35, %v1549_v2  ;;  %v2855_v35 = vld [vmem:[%s3925_s4 + $0x78] sm:$0xff] }
 0x698   :  { %v1608_v52 = vrot.slane %v1607_v29, 2  ;;  %v1633_v61 = vrot.slane %v1632_v30, 4  ;;  %v1628_v38 = vrot.slane %v1627_v32, 1 }
 0x699   :  { %v1640_v53 = vsel %vm68_vm1, %v1596_v34, 0.0  ;;  %v1639_v54 = vsel %vm68_vm1, %v1595_v62, 0.0 }
 0x69a   :  { %v1609_v49 = vadd.f32 %v1608_v52, %v1607_v29  ;;  %v1634_v57 = vadd.f32 %v1633_v61, %v1632_v30  ;;  %v1564_v58 = vpop.permute.xlu0 %1563  ;;  %v1560_v37 = vpop.permute.xlu1 %1559  ;;  %v1641_v63 = vadd.f32 %v1640_v53, %v1639_v54  ;;  %v1629_v39 = vadd.f32 %v1628_v38, %v1627_v32  ;;  %v2856_v52 = vld [vmem:[%s3925_s4 + $0x70] sm:$0xff] }
 0x69b   :  { %v1598_v42 = vmul.f32 %v2851_v40, %v1564_v58  ;;  %v1597_v16 = vmul.f32 %v2852_v28, %v1560_v37 }
 0x69c   :  { %v1610_v44 = vrot.slane %v1609_v49, 1  ;;  %v1635_v6 = vrot.slane %v1634_v57, 2  ;;  %v1642_v45 = vrot.slane %v1641_v63, 4 }
 0x69d   :  { %v1649_v46 = vsel %vm68_vm1, %v1598_v42, 0.0  ;;  %v1648_v22 = vsel %vm68_vm1, %v1597_v16, 0.0 }
 0x69e   :  { %v1611_v60 = vadd.f32 %v1610_v44, %v1609_v49  ;;  %v1636_v48 = vadd.f32 %v1635_v6, %v1634_v57  ;;  %v1650_v50 = vadd.f32 %v1649_v46, %v1648_v22  ;;  %v1575_v51 = vpop.permute.xlu0 %1574  ;;  %v1571_v4 = vpop.permute.xlu1 %1570  ;;  %v1643_v17 = vadd.f32 %v1642_v45, %v1641_v63 }
 0x69f   :  { %v1600_v8 = vmul.f32 %v2853_v7, %v1575_v51  ;;  %v1599_v0 = vmul.f32 %v2854_v9, %v1571_v4  ;;  %v1718_v49 = vrot.slane %v3504_v56, %v3044_v18 }
 0x6a0   :  { %v1821_v10 = vsel %vm834_vm4, %v1620_v47, %v1611_v60  ;;  %v1637_v12 = vrot.slane %v1636_v48, 1  ;;  %v1651_v14 = vrot.slane %v1650_v50, 4  ;;  %v1644_v23 = vrot.slane %v1643_v17, 2 }
 0x6a1   :  { %v1822_v15 = vsel %vm836_vm5, %v1629_v39, %v1821_v10  ;;  %v1658_v25 = vsel %vm68_vm1, %v1600_v8, 0.0  ;;  %v1657_v29 = vsel %vm68_vm1, %v1599_v0, 0.0  ;;  %v1720_v46 = vmul.f32 %v1718_v49, %v1620_v47 }
 0x6a2   :  { %v1638_v30 = vadd.f32 %v1637_v12, %v1636_v48  ;;  %v1652_v31 = vadd.f32 %v1651_v14, %v1650_v50  ;;  %v1659_v2 = vadd.f32 %v1658_v25, %v1657_v29  ;;  %v1586_v32 = vpop.permute.xlu0 %1585  ;;  %v1582_v33 = vpop.permute.xlu1 %1581  ;;  %v1645_v34 = vadd.f32 %v1644_v23, %v1643_v17 }
 0x6a3   :  { %v1602_v62 = vmul.f32 %v2855_v35, %v1586_v32  ;;  %v1601_v61 = vmul.f32 %v2856_v52, %v1582_v33  ;;  %v1719_v4 = vmul.f32 %v1718_v49, %v1611_v60  ;;  %v1735_v0 = vrot.slane %v1720_v46, 7  ;;  %v1836_v46 = vld [vmem:[%s3933_s12 + $0x28] sm:$0xff] }
 0x6a4   :  { %v1823_v53 = vsel %vm838_vm6, %v1638_v30, %v1822_v15  ;;  %v1653_v54 = vrot.slane %v1652_v31, 2  ;;  %v1660_v55 = vrot.slane %v1659_v2, 4  ;;  %v1646_v57 = vrot.slane %v1645_v34, 1 }
 0x6a5   :  { %v1667_v58 = vsel %vm68_vm1, %v1602_v62, 0.0  ;;  %v1666_v37 = vsel %vm68_vm1, %v1601_v61, 0.0  ;;  %v1722_v17 = vmul.f32 %v1718_v49, %v1638_v30  ;;  %v1721_v10 = vmul.f32 %v1718_v49, %v1629_v39 }
 0x6a6   :  { %v1654_v38 = vadd.f32 %v1653_v54, %v1652_v31  ;;  %v1661_v63 = vadd.f32 %v1660_v55, %v1659_v2  ;;  %v1668_v40 = vadd.f32 %v1667_v58, %v1666_v37  ;;  %v1774_v42 = vpop.permute.xlu1 %1773  ;;  %v1647_v28 = vadd.f32 %v1646_v57, %v1645_v34  ;;  %v3731_v58 = vld [vmem:[%s3921_s0] sm:$0xff] }
 0x6a7   :  { %v1776_v16 = vsel %vm68_vm1, %v1774_v42, 0.0  ;;  %v1736_v25 = vsel %vm834_vm4, %v1735_v0, %v1719_v4  ;;  %v1739_v47 = vrot.slane %v1722_v17, 5  ;;  %v1737_v32 = vrot.slane %v1721_v10, 6  ;;  %v1831_v42 = vld [vmem:[%s3933_s12] sm:$0xff]  ;;  %v1840_v17 = vld [vmem:[%s3933_s12 + $0x48] sm:$0xff] }
 0x6a8   :  { %v1655_v44 = vrot.slane %v1654_v38, 1  ;;  %v1662_v6 = vrot.slane %v1661_v63, 2  ;;  %v1669_v45 = vrot.slane %v1668_v40, 4  ;;  %1777 = vadd.xlane.f32.xlu0 %v1776_v16  ;;  %v1824_v22 = vsel %vm840_vm7, %v1647_v28, %v1823_v53  ;;  %v1833_v16 = vld [vmem:[%s3933_s12 + $0x10] sm:$0xff]  ;;  %v1839_v4 = vld [vmem:[%s3933_s12 + $0x40] sm:$0xff] }
 0x6a9   :  { %v1723_v12 = vmul.f32 %v1718_v49, %v1647_v28  ;;  %v1738_v34 = vsel %vm836_vm5, %v1737_v32, %v1736_v25  ;;  %v1783_v39 = vrot.slane %v3504_v56, %v3525_v1  ;;  %v1832_v28 = vld [vmem:[%s3933_s12 + $0x8] sm:$0xff] }
 0x6aa   :  { %v1656_v48 = vadd.f32 %v1655_v44, %v1654_v38  ;;  %v1663_v50 = vadd.f32 %v1662_v6, %v1661_v63  ;;  %v1670_v51 = vadd.f32 %v1669_v45, %v1668_v40  ;;  %v1740_v52 = vsel %vm838_vm6, %v1739_v47, %v1738_v34  ;;  %v1835_v45 = vld [vmem:[%s3933_s12 + $0x20] sm:$0xff] }
 0x6ab   :  { %v1741_v60 = vrot.slane %v1723_v12, 4  ;;  %v1784_v37 = vmul.f32 %v3731_v58, %v1783_v39  ;;  %v2028_v40 = vrot.slane %v3504_v56, %v3535_v21  ;;  %v2692_v44 = vpack.c.bf16 %v1832_v28, %v1831_v42 }
 0x6ac   :  { %v1825_v7 = vsel %vm3939_vm8, %v1656_v48, %v1824_v22  ;;  %v1664_v8 = vrot.slane %v1663_v50, 1  ;;  %v1671_v9 = vrot.slane %v1670_v51, 2  ;;  %v1724_v23 = vmul.f32 %v1718_v49, %v1656_v48  ;;  %v1837_v48 = vld [vmem:[%s3933_s12 + $0x30] sm:$0xff] }
 0x6ad   :  { %v1742_v53 = vsel %vm840_vm7, %v1741_v60, %v1740_v52  ;;  %v1785_v63 = vsel %vm68_vm1, %v1784_v37, 0.0  ;;  %2693 = vmatpush3.bf16.msra.mxu1 %v2692_v44  ;;  %v2698_v22 = vpack.c.bf16 %v1836_v46, %v1835_v45  ;;  %v2045_v39 = vrot.slane %v3504_v56, %v3540_v20  ;;  %v2069_v44 = vld [vmem:[%s3927_s6] sm:$0xff] }
 0x6ae   :  { %v1665_v14 = vadd.f32 %v1664_v8, %v1663_v50  ;;  %v1672_v15 = vadd.f32 %v1671_v9, %v1670_v51  ;;  %v1743_v33 = vrot.slane %v1724_v23, 3  ;;  %2694 = vmatprep.subr.bf16.mxu1 %v2906_v3  ;;  %v1838_v50 = vld [vmem:[%s3933_s12 + $0x38] sm:$0xff]  ;;  %v2095_v45 = vrot.slane %v2069_v44, %v3516_v43 }
 0x6af   :  { %v2701_v51 = vpack.c.bf16 %v1838_v50, %v1837_v48  ;;  %v2106_v46 = vrot.slane %v2069_v44, %v3499_v36 }
 0x6b0   :  { %v1673_v29 = vrot.slane %v1672_v15, 1  ;;  %v1725_v31 = vmul.f32 %v1718_v49, %v1665_v14  ;;  %v1826_v2 = vsel %vm3938_vm9, %v1665_v14, %v1825_v7  ;;  %v1744_v54 = vsel %vm3939_vm8, %v1743_v33, %v1742_v53 }
 0x6b1   :  { %v2704_v7 = vpack.c.bf16 %v1840_v17, %v1839_v4 }
 0x6b2   :  { %v1674_v30 = vadd.f32 %v1673_v29, %v1672_v15  ;;  %v1745_v35 = vrot.slane %v1725_v31, 2 }
 0x6b4   :  { %v1726_v62 = vmul.f32 %v1718_v49, %v1674_v30  ;;  %v1827_v61 = vsel %vm3937_vm10, %v1674_v30, %v1826_v2  ;;  %v1746_v57 = vsel %vm3938_vm9, %v1745_v35, %v1744_v54  ;;  %v2020_v35 = vrot.slane %v3504_v56, %v3530_v5 }
 0x6b6   :  { %v1747_v55 = vrot.slane %v1726_v62, 1 }
 0x6b8   :  { %v1748_v49 = vsel %vm3937_vm10, %v1747_v55, %v1746_v57  ;;  %v1927_v57 = vld [vmem:[%s3934_s13 + $0x8] sm:$0xff] }
 0x6b9   :  { %v1750_v38 = vsel %vm68_vm1, %v1748_v49, 0.0 }
 0x6ba   :  { %1751 = vadd.xlane.f32.xlu1 %v1750_v38  ;;  %v1929_v38 = vld [vmem:[%s3934_s13 + $0x18] sm:$0xff] }
 0x6be   :  { %1786 = vadd.xlane.f32.xlu1 %v1785_v63  ;;  %1842 = vrot.lane.b32.xlu0 %v3640_v27, %s2909_s2  ;;  %v1834_v27 = vld [vmem:[%s3933_s12 + $0x18] sm:$0xff] }
 0x6bf   :  { %v2695_v6 = vpack.c.bf16 %v1834_v27, %v1833_v16  ;;  %v2913_v16 = vmov 0   ;;  %v2073_v27 = vrot.slane %v2069_v44, %v3052_v26 }
 0x6c0   :  { %2733 = vset.pattern.permute.xlu0 %v2913_v16 }
 0x6c1   :  { %2696 = vmatpush3.bf16.msra.mxu1 %v2695_v6  ;;  %v2084_v6 = vrot.slane %v2069_v44, %v3044_v18 }
 0x6c2   :  { %2697 = vmatprep.subr.bf16.mxu1 %v2906_v3 }
 0x6c5   :  { %2699 = vmatpush3.bf16.msra.mxu1 %v2698_v22  ;;  %v2117_v22 = vrot.slane %v2069_v44, %v3525_v1 }
 0x6c6   :  { %2700 = vmatprep.subr.bf16.mxu1 %v2906_v3 }
 0x6c9   :  { %2702 = vmatpush3.bf16.msra.mxu1 %v2701_v51 }
 0x6ca   :  { %2703 = vmatprep.subr.bf16.mxu1 %v2906_v3 }
 0x6cd   :  { %2705 = vmatpush3.bf16.msra.mxu1 %v2704_v7  ;;  %v2444_v7 = vld [vmem:[%s3932_s11 + $0x8] ss:$0 sm:$0xff]  ;;  %s2914_s11 = smov 80  }
 0x6ce   :  { %2706 = vmatprep.subr.bf16.mxu1 %v2906_v3 }
 0x6cf   :  { %2030 = vrot.lane.b32.xlu1 %v2028_v40, %s2911_s28  ;;  %v2440_v40 = vld [vmem:[%s3933_s12 + $0x50] ss:$0 sm:$0xff] }
 0x6f2   :  { %v1714_v8 = vpop.xlane.xlu0 %1713 }
 0x6f6   :  { %v1761_v9 = vpop.xlane.xlu0 %1760 }
 0x735   :  { %v1778_v14 = vpop.xlane.xlu0 %1777 }
 0x739   :  { %v1843_v62 = vpop.permute.xlu0 %1842 }
 0x747   :  { %v1752_v0 = vpop.xlane.xlu1 %1751 }
 0x748   :  { %v1753_v10 = vadd.f32 %v1752_v0, %v1714_v8  ;;  %v2442_v0 = vld [vmem:[%s3934_s13 + $0x20] ss:$0 sm:$0xff] }
 0x74a   :  { %v1762_v12 = vadd.f32 %v1761_v9, %v1753_v10 }
 0x74b   :  { %v1787_v15 = vpop.xlane.xlu1 %1786 }
 0x74c   :  { %v1779_v23 = vadd.f32 %v1778_v14, %v1762_v12 }
 0x74e   :  { %v1788_v25 = vadd.f32 %v1787_v15, %v1779_v23 }
 0x74f   :  { %v2031_v47 = vpop.permute.xlu1 %2030 }
 0x750   :  { %v2439_v29 = vmul.f32 -1.442695, %v1788_v25  ;;  %v2033_v31 = vmul.f32 %v2031_v47, %v3172_v19  ;;  %v2128_v47 = vrot.slane %v2069_v44, %v3530_v5 }
 0x752   :  { %2812 = vpow2.f32 %v2439_v29  ;;  %2035 = vrot.lane.b32.xlu1 %v2033_v31, %s2910_s19  ;;  %v2139_v31 = vrot.slane %v2069_v44, %v3535_v21 }
 0x75c   :  { %v2813_v2 = vpop.eup %2812 }
 0x75d   :  { %v1792_v32 = vadd.f32 1.0, %v2813_v2  ;;  %v2150_v2 = vrot.slane %v2069_v44, %v3540_v20 }
 0x75f   :  { %2814 = vrcp.f32 %v1792_v32 }
 0x769   :  { %v2815_v60 = vpop.eup %2814 }
 0x76a   :  { %v1812_v30 = vsub.f32 1.0, %v2815_v60  ;;  %v1811_v33 = vmul.f32 %v2815_v60, %v3632_v13  ;;  %v2046_v13 = vmul.f32 %v3731_v58, %v2045_v39 }
 0x76c   :  { %v1829_v34 = vmul.f32 %v1827_v61, %v1812_v30  ;;  %v2047_v56 = vsel %vm68_vm1, %v2046_v13, 0.0 }
 0x76e   :  { %v3784_v52 = vadd.f32 %v1829_v34, %v1811_v33 }
 0x770   :  { %v1845_v53 = vsel %vm68_vm1, %v3784_v52, %v3172_v19  ;;  %v2021_v54 = vmul.f32 %v2020_v35, %v3784_v52  ;;  %v1926_v19 = vld [vmem:[%s3934_s13] sm:$0xff] }
 0x771   :  { %v1847_v61 = vsel %vm1846_vm13, %v1845_v53, %v1843_v62  ;;  %v2707_v58 = vpack.c.bf16 %v1927_v57, %v1926_v19 }
 0x772   :  { %2641 = vmatmul.mubr.msk.f32.vlgmr.msra.gmra.mrb[18].mxu1 %vm1852_vm14, %v1847_v61  ;;  %v2022_v55 = vsel %vm68_vm1, %v2021_v54, 0.0 }
 0x773   :  { %2023 = vadd.xlane.f32.xlu0 %v2022_v55  ;;  %2651 = vmatprep.mubr.msk.f32.mxu1 %vm2907_vm0, %v2908_v11  ;;  %v1928_v11 = vld [vmem:[%s3934_s13 + $0x10] sm:$0xff]  ;;  %s2915_s13 = smov [#allocation4]  }
 0x774   :  { %2708 = vmatpush3.bf16.msra.mxu1 %v2707_v58  ;;  %v2710_v63 = vpack.c.bf16 %v1929_v38, %v1928_v11 }
 0x775   :  { %2709 = vmatprep.subr.bf16.mxu1 %v2906_v3 }
 0x777   :  { %2048 = vadd.xlane.f32.xlu0 %v2047_v56 }
 0x778   :  { %2711 = vmatpush3.bf16.msra.mxu1 %v2710_v63 }
 0x7c4   :  { %v2036_v37 = vpop.permute.xlu1 %2035 }
 0x7c5   :  { %v2038_v49 = vsel %vm68_vm1, %v2036_v37, 0.0 }
 0x7c6   :  { %2039 = vadd.xlane.f32.xlu1 %v2038_v49 }
 0x7d7   :  { %2075 = vbcast.lane.b32.xlu1 %v2073_v27, 256 }
 0x7db   :  { %2079 = vbcast.lane.b32.xlu1 %v2073_v27, 264 }
 0x7df   :  { %2086 = vbcast.lane.b32.xlu1 %v2084_v6, 256 }
 0x7e3   :  { %2090 = vbcast.lane.b32.xlu1 %v2084_v6, 264 }
 0x7e7   :  { %2097 = vbcast.lane.b32.xlu1 %v2095_v45, 256 }
 0x7eb   :  { %2101 = vbcast.lane.b32.xlu1 %v2095_v45, 264 }
 0x7ef   :  { %2108 = vbcast.lane.b32.xlu1 %v2106_v46, 256 }
 0x7f3   :  { %2112 = vbcast.lane.b32.xlu1 %v2106_v46, 264 }
 0x7f7   :  { %2123 = vbcast.lane.b32.xlu1 %v2117_v22, 264 }
 0x7fb   :  { %2134 = vbcast.lane.b32.xlu1 %v2128_v47, 264 }
 0x7ff   :  { %2145 = vbcast.lane.b32.xlu1 %v2139_v31, 264 }
 0x800   :  { %v2024_v48 = vpop.xlane.xlu0 %2023 }
 0x803   :  { %2156 = vbcast.lane.b32.xlu1 %v2150_v2, 264 }
 0x804   :  { %v2049_v4 = vpop.xlane.xlu0 %2048 }
 0x845   :  { %v1922_v42 = vpop.f32.mrb[18].mxu1 }
 0x846   :  { %v1923_v3 = vadd.f32 %v2440_v40, %v1922_v42  ;;  %v2642_v28 = vpop.f32.mrb[19].mxu1 }
 0x848   :  { %2652 = vmatmul.mubr.msk.f32.vlgmr.msra.gmra.mrb[20].mxu1 %vm68_vm1, %v1923_v3 }
 0x853   :  { %v2040_v50 = vpop.xlane.xlu1 %2039 }
 0x854   :  { %v2041_v51 = vadd.f32 %v2040_v50, %v2024_v48 }
 0x856   :  { %v2050_v17 = vadd.f32 %v2049_v4, %v2041_v51 }
 0x858   :  { %v2055_v8 = vadd.f32 %v2444_v7, %v2050_v17 }
 0x85a   :  { %v2445_v9 = vmul.f32 -1.442695, %v2055_v8 }
 0x85c   :  { %2816 = vpow2.f32 %v2445_v9 }
 0x866   :  { %v2817_v15 = vpop.eup %2816 }
 0x867   :  { %v2059_v23 = vadd.f32 1.0, %v2817_v15 }
 0x869   :  { %2818 = vrcp.f32 %v2059_v23 }
 0x873   :  { %v2819_v25 = vpop.eup %2818 }
 0x874   :  { %v2062_v29 = vsub.f32 1.0, %v2819_v25 }
 0x91b   :  { %v2004_v10 = vpop.f32.mrb[20].mxu1 }
 0x91c   :  { %v2005_v12 = vadd.f32 %v2442_v0, %v2004_v10  ;;  %v2653_v14 = vpop.f32.mrb[21].mxu1 }
 0x91e   :  { %2008 = vmax.xlane.f32.xlu0 %v2005_v12 }
 0x934   :  { %2065 = vperm.xlu0 %2733, %v2062_v29  }
 0x938   :  { %2119 = vbcast.lane.b32.xlu0 %v2117_v22, 256 }
 0x93c   :  { %2130 = vbcast.lane.b32.xlu0 %v2128_v47, 256 }
 0x940   :  { %2141 = vbcast.lane.b32.xlu0 %v2139_v31, 256 }
 0x944   :  { %2152 = vbcast.lane.b32.xlu0 %v2150_v2, 256 }
 0x9ab   :  { %v2009_v32 = vpop.xlane.xlu0 %2008 }
 0x9b3   :  { %v2066_v60 = vpop.permute.xlu0 %2065 }
 0x9b4   :  { %v2068_v30 = vmul.f32 %v2066_v60, %v3511_v41 }
 0x9b6   :  { %v2177_v33 = vrot.slane %v2068_v30, %v3052_v26  ;;  %v2188_v34 = vrot.slane %v2068_v30, %v3044_v18  ;;  %v2199_v35 = vrot.slane %v2068_v30, %v3516_v43  ;;  %v2210_v39 = vrot.slane %v2068_v30, %v3499_v36  ;;  %v2076_v36 = vpop.permute.xlu1 %2075 }
 0x9b7   :  { %v2221_v62 = vrot.slane %v2068_v30, %v3525_v1  ;;  %v2232_v26 = vrot.slane %v2068_v30, %v3530_v5  ;;  %v2243_v18 = vrot.slane %v2068_v30, %v3535_v21  ;;  %v2254_v43 = vrot.slane %v2068_v30, %v3540_v20 }
 0x9b8   :  { %2183 = vbcast.lane.b32.xlu1 %v2177_v33, 264  ;;  %2179 = vbcast.lane.b32.xlu0 %v2177_v33, 256  ;;  %v2010_v5 = vsub.f32 %v2005_v12, %v2009_v32  ;;  %vm2158_vm15 = vcmp.eq.s32.totalorder %v3412_v59, %v2076_v36 }
 0x9ba   :  { %v2080_v1 = vpop.permute.xlu1 %2079  ;;  %v2011_v53 = vmul.f32 1.442695, %v2010_v5 }
 0x9bb   :  { %vm2159_vm0 = vcmp.eq.s32.totalorder %v3412_v59, %v2080_v1 }
 0x9bc   :  { %2194 = vbcast.lane.b32.xlu1 %v2188_v34, 264  ;;  %2190 = vbcast.lane.b32.xlu0 %v2188_v34, 256  ;;  %2820 = vpow2.f32 %v2011_v53 }
 0x9be   :  { %v2087_v54 = vpop.permute.xlu1 %2086 }
 0x9bf   :  { %vm2160_vm2 = vcmp.eq.s32.totalorder %v3412_v59, %v2087_v54 }
 0x9c0   :  { %2205 = vbcast.lane.b32.xlu1 %v2199_v35, 264  ;;  %2201 = vbcast.lane.b32.xlu0 %v2199_v35, 256 }
 0x9c2   :  { %v2091_v21 = vpop.permute.xlu1 %2090 }
 0x9c3   :  { %vm2161_vm3 = vcmp.eq.s32.totalorder %v3412_v59, %v2091_v21 }
 0x9c4   :  { %2216 = vbcast.lane.b32.xlu1 %v2210_v39, 264  ;;  %2212 = vbcast.lane.b32.xlu0 %v2210_v39, 256 }
 0x9c6   :  { %v2098_v13 = vpop.permute.xlu1 %2097  ;;  %v3845_v61 = vpop.eup %2820 }
 0x9c7   :  { %vm2162_vm11 = vcmp.eq.s32.totalorder %v3412_v59, %v2098_v13 }
 0x9c8   :  { %2227 = vbcast.lane.b32.xlu1 %v2221_v62, 264  ;;  %2223 = vbcast.lane.b32.xlu0 %v2221_v62, 256 }
 0x9ca   :  { %v2102_v20 = vpop.permute.xlu1 %2101 }
 0x9cb   :  { %vm2163_vm12 = vcmp.eq.s32.totalorder %v3412_v59, %v2102_v20 }
 0x9cc   :  { %2238 = vbcast.lane.b32.xlu1 %v2232_v26, 264  ;;  %2234 = vbcast.lane.b32.xlu0 %v2232_v26, 256 }
 0x9ce   :  { %v2109_v55 = vpop.permute.xlu1 %2108 }
 0x9d0   :  { %2249 = vbcast.lane.b32.xlu1 %v2243_v18, 264  ;;  %2245 = vbcast.lane.b32.xlu0 %v2243_v18, 256 }
 0x9d2   :  { %v2113_v56 = vpop.permute.xlu1 %2112 }
 0x9d4   :  { %2260 = vbcast.lane.b32.xlu1 %v2254_v43, 264  ;;  %2256 = vbcast.lane.b32.xlu0 %v2254_v43, 256 }
 0x9d6   :  { %v2124_v19 = vpop.permute.xlu1 %2123 }
 0x9d8   :  { %2359 = vrot.lane.b32.xlu1 %v3784_v52, %s2911_s28  ;;  %2336 = vperm.xlu0 %2733, %v2819_v25   ;;  %v2120_v52 = vpop.permute.xlu0 %2119 }
 0x9da   :  { %v3850_v57 = vpop.permute.xlu1 %2134 }
 0x9db   :  { %vm2169_vm9 = vcmp.eq.s32.totalorder %v3412_v59, %v3850_v57 }
 0x9dc   :  { %2363 = vrot.lane.b32.xlu0 %v3511_v41, %s2909_s2  ;;  %v3848_v41 = vpop.permute.xlu0 %2130  ;;  %s2391_s2 = sshll.u32 %s2915_s13, 4  ;;  %s2392_s2 = int_to_ptr.vmem [resolvable:$true] %s2391_s2 }
 0x9dd   :  { %s2858_s28 = scalar_lea.vmem %s2392_s2, 128  ;;  %p2863_p1 = scmp.lt.s32.totalorder %s2392_s2, %s2392_s2 }
 0x9de   :  { %v3854_v37 = vpop.permute.xlu1 %2145  ;;  %p2859_p0 = scmp.ne.s32.totalorder %s2392_s2, %s2858_s28  ;;  %p2864_p2 = scmp.lt.s32.totalorder %s2858_s28, %s2858_s28 }
 0x9e0   :  { %v3852_v58 = vpop.permute.xlu0 %2141  ;;  %p2865_p3 = por %p2864_p2, %p2863_p1 }
 0x9e1   :  { %vm2170_vm10 = vcmp.eq.s32.totalorder %v3412_v59, %v3852_v58 }
 0x9e2   :  { %v3858_v11 = vpop.permute.xlu1 %2156  ;;  %p2866_p4 = pnand %p2865_p3, %p2859_p0 }
 0x9e4   :  { %v3856_v49 = vpop.permute.xlu0 %2152 }
 0x9e5   :  { %vm2172_vm8 = vcmp.eq.s32.totalorder %v3412_v59, %v3856_v49 }
 0x9fc   :  { %2013 = vadd.xlane.f32.xlu1 %v3845_v61 }
 0xa0d   :  { %2366 = vrot.lane.b32.xlu1 %v2819_v25, %s2914_s11 }
 0xa2a   :  { %v2180_v38 = vpop.permute.xlu0 %2179  ;;  %v2184_v63 = vpop.permute.xlu1 %2183 }
 0xa2b   :  { %v2262_v40 = vsel %vm2158_vm15, %v2180_v38, 0.0  ;;  %v2263_v42 = vsel %vm2159_vm0, %v2184_v63, 0.0  ;;  %vm2164_vm15 = vcmp.eq.s32.totalorder %v3412_v59, %v2109_v55  ;;  %vm2166_vm0 = vcmp.eq.s32.totalorder %v3412_v59, %v2120_v52 }
 0xa2c   :  { %v2278_v3 = vadd.f32 %v2263_v42, %v2262_v40 }
 0xa2e   :  { %v2279_v28 = vrot.slane %v2278_v3, 4  ;;  %v2191_v16 = vpop.permute.xlu0 %2190  ;;  %v2195_v44 = vpop.permute.xlu1 %2194 }
 0xa2f   :  { %v2264_v27 = vsel %vm2160_vm2, %v2191_v16, 0.0  ;;  %v2265_v6 = vsel %vm2161_vm3, %v2195_v44, 0.0  ;;  %vm2168_vm2 = vcmp.eq.s32.totalorder %v3412_v59, %v3848_v41  ;;  %vm2167_vm3 = vcmp.eq.s32.totalorder %v3412_v59, %v2124_v19 }
 0xa30   :  { %v2280_v45 = vadd.f32 %v2279_v28, %v2278_v3  ;;  %v2285_v46 = vadd.f32 %v2265_v6, %v2264_v27 }
 0xa32   :  { %v2281_v22 = vrot.slane %v2280_v45, 2  ;;  %v2286_v48 = vrot.slane %v2285_v46, 4  ;;  %v2202_v12 = vpop.permute.xlu0 %2201  ;;  %v2206_v14 = vpop.permute.xlu1 %2205 }
 0xa33   :  { %v2266_v60 = vsel %vm2162_vm11, %v2202_v12, 0.0  ;;  %v2267_v30 = vsel %vm2163_vm12, %v2206_v14, 0.0  ;;  %vm2171_vm11 = vcmp.eq.s32.totalorder %v3412_v59, %v3854_v37  ;;  %vm2173_vm12 = vcmp.eq.s32.totalorder %v3412_v59, %v3858_v11 }
 0xa34   :  { %v2282_v50 = vadd.f32 %v2281_v22, %v2280_v45  ;;  %v2287_v51 = vadd.f32 %v2286_v48, %v2285_v46  ;;  %v2292_v18 = vadd.f32 %v2267_v30, %v2266_v60 }
 0xa36   :  { %v2288_v4 = vrot.slane %v2287_v51, 2  ;;  %v2283_v17 = vrot.slane %v2282_v50, 1  ;;  %v2213_v15 = vpop.permute.xlu0 %2212  ;;  %v2217_v23 = vpop.permute.xlu1 %2216  ;;  %v2293_v55 = vrot.slane %v2292_v18, 4 }
 0xa37   :  { %v2268_v33 = vsel %vm2164_vm15, %v2213_v15, 0.0 }
 0xa38   :  { %v2289_v7 = vadd.f32 %v2288_v4, %v2287_v51  ;;  %v2284_v9 = vadd.f32 %v2283_v17, %v2282_v50  ;;  %v2294_v58 = vadd.f32 %v2293_v55, %v2292_v18 }
 0xa3a   :  { %v2290_v8 = vrot.slane %v2289_v7, 1  ;;  %v2224_v25 = vpop.permute.xlu0 %2223  ;;  %v2228_v47 = vpop.permute.xlu1 %2227 }
 0xa3b   :  { %v2270_v35 = vsel %vm2166_vm0, %v2224_v25, 0.0  ;;  %v2271_v39 = vsel %vm2167_vm3, %v2228_v47, 0.0 }
 0xa3c   :  { %v2291_v0 = vadd.f32 %v2290_v8, %v2289_v7  ;;  %v2306_v54 = vadd.f32 %v2271_v39, %v2270_v35 }
 0xa3e   :  { %v3865_v10 = vsel %vm834_vm4, %v2291_v0, %v2284_v9  ;;  %v2235_v29 = vpop.permute.xlu0 %2234  ;;  %v2239_v31 = vpop.permute.xlu1 %2238  ;;  %vm2165_vm4 = vcmp.eq.s32.totalorder %v3412_v59, %v2113_v56  ;;  %v2307_v41 = vrot.slane %v2306_v54, 4  ;;  %v2295_v59 = vrot.slane %v2294_v58, 2 }
 0xa3f   :  { %v2269_v34 = vsel %vm2165_vm4, %v2217_v23, 0.0  ;;  %v2272_v43 = vsel %vm2168_vm2, %v2235_v29, 0.0  ;;  %v2273_v36 = vsel %vm2169_vm9, %v2239_v31, 0.0 }
 0xa40   :  { %v2299_v1 = vadd.f32 %v2269_v34, %v2268_v33  ;;  %v2313_v20 = vadd.f32 %v2273_v36, %v2272_v43  ;;  %v2308_v63 = vadd.f32 %v2307_v41, %v2306_v54  ;;  %v2296_v6 = vadd.f32 %v2295_v59, %v2294_v58 }
 0xa42   :  { %v2246_v2 = vpop.permute.xlu0 %2245  ;;  %v2250_v32 = vpop.permute.xlu1 %2249  ;;  %v2300_v52 = vrot.slane %v2299_v1, 4  ;;  %v2314_v57 = vrot.slane %v2313_v20, 4  ;;  %v2309_v16 = vrot.slane %v2308_v63, 2  ;;  %v2297_v17 = vrot.slane %v2296_v6, 1 }
 0xa43   :  { %v2274_v5 = vsel %vm2170_vm10, %v2246_v2, 0.0  ;;  %v2275_v53 = vsel %vm2171_vm11, %v2250_v32, 0.0 }
 0xa44   :  { %v2320_v56 = vadd.f32 %v2275_v53, %v2274_v5  ;;  %v2301_v49 = vadd.f32 %v2300_v52, %v2299_v1  ;;  %v2315_v40 = vadd.f32 %v2314_v57, %v2313_v20  ;;  %v2310_v48 = vadd.f32 %v2309_v16, %v2308_v63 }
 0xa45   :  { %v2298_v47 = vadd.f32 %v2297_v17, %v2296_v6 }
 0xa46   :  { %v2257_v62 = vpop.permute.xlu0 %2256  ;;  %v2261_v26 = vpop.permute.xlu1 %2260  ;;  %v2321_v37 = vrot.slane %v2320_v56, 4  ;;  %v2302_v42 = vrot.slane %v2301_v49, 2  ;;  %v2316_v27 = vrot.slane %v2315_v40, 2  ;;  %v2311_v12 = vrot.slane %v2310_v48, 1 }
 0xa47   :  { %v2276_v21 = vsel %vm2172_vm8, %v2257_v62, 0.0  ;;  %v2277_v13 = vsel %vm2173_vm12, %v2261_v26, 0.0  ;;  %vm2372_vm8 = vcmask 662528  }
 0xa48   :  { %v2327_v19 = vadd.f32 %v2277_v13, %v2276_v21  ;;  %v2322_v11 = vadd.f32 %v2321_v37, %v2320_v56  ;;  %v2303_v46 = vadd.f32 %v2302_v42, %v2301_v49  ;;  %v2317_v51 = vadd.f32 %v2316_v27, %v2315_v40 }
 0xa49   :  { %v2312_v60 = vadd.f32 %v2311_v12, %v2310_v48 }
 0xa4a   :  { %v2328_v38 = vrot.slane %v2327_v19, 4  ;;  %v2360_v44 = vpop.permute.xlu1 %2359  ;;  %v2323_v45 = vrot.slane %v2322_v11, 2  ;;  %v2304_v8 = vrot.slane %v2303_v46, 1  ;;  %v2318_v23 = vrot.slane %v2317_v51, 1 }
 0xa4b   :  { %v2369_v0 = vsel %vm68_vm1, %v3189_v24, %v2360_v44 }
 0xa4c   :  { %v2329_v3 = vadd.f32 %v2328_v38, %v2327_v19  ;;  %v2324_v7 = vadd.f32 %v2323_v45, %v2322_v11  ;;  %v2305_v2 = vadd.f32 %v2304_v8, %v2303_v46 }
 0xa4e   :  { %v2330_v22 = vrot.slane %v2329_v3, 2  ;;  %v2325_v29 = vrot.slane %v2324_v7, 1 }
 0xa50   :  { %v2331_v9 = vadd.f32 %v2330_v22, %v2329_v3 }
 0xa52   :  { %v2332_v32 = vrot.slane %v2331_v9, 1 }
 0xa57   :  { %v2337_v28 = vpop.permute.xlu0 %2336 }
 0xa5b   :  { %v2364_v4 = vpop.permute.xlu0 %2363 }
 0xa5c   :  { %v2370_v14 = vsel %vm1846_vm13, %v2369_v0, %v2364_v4 }
 0xa89   :  { %v2014_v50 = vpop.xlane.xlu1 %2013 }
 0xa8a   :  { %2822 = vrcp.f32 %v2014_v50 }
 0xa8d   :  { %v2367_v15 = vpop.permute.xlu1 %2366 }
 0xa8e   :  { %v2371_v25 = vsel %vm1852_vm14, %v2370_v14, %v2367_v15 }
 0xa8f   :  { %v2373_v31 = vsel %vm2372_vm8, %v2371_v25, 0.0 }
 0xa90   :  { %2374 = vst [vmem:[#allocation4] sm:$0xff] %v2373_v31 }
 0xa91   :  { %2869 = shalt.err (!%p2866_p4)
}
 0xa92   :  { %s2870_s8 = scalar_lea.hbm %s3936_s15, 128 }
 0xa93   :  { %p2871_p5 = scmp.ne.s32.totalorder %s3936_s15, %s2870_s8  ;;  %p2874_p6 = scmp.lt.u32.totalorder %s2870_s8, %s3936_s15 }
 0xa95   :  { %p2876_p7 = pnand %p2874_p6, %p2871_p5 }
 0xa97   :  { %2879 = shalt.err (!%p2876_p7)
}
 0xa98   :  { %2394 = dma.vmem_to_hbm [thread:$0]  %s2392_s2, 128, %s3936_s15, [#allocation5]   ;;  %v2319_v24 = vadd.f32 %v2318_v23, %v2317_v51  ;;  %v2349_v30 = vsel %vm836_vm5, %v2298_v47, %v3865_v10  ;;  %v2326_v33 = vadd.f32 %v2325_v29, %v2324_v7  ;;  %v2823_v34 = vpop.eup %2822  ;;  %v2333_v35 = vadd.f32 %v2332_v32, %v2331_v9 }
 0xa99   :  { %v2350_v39 = vsel %vm838_vm6, %v2305_v2, %v2349_v30  ;;  %v2016_v62 = vmul.f32 %v2823_v34, %v3845_v61  ;;  %vm3940_vm1 = vcmask 1045509   ;;  %s2916_s19 = smov [#allocation2]   ;;  %vm3941_vm9 = vcmask 1046534  }
 0xa9a   :  { %v2351_v26 = vsel %vm840_vm7, %v2312_v60, %v2350_v39  ;;  %s2381_s4 = sshll.u32 %s2916_s19, 4  ;;  %vm3942_vm10 = vcmask 1047559   ;;  %s2382_s4 = int_to_ptr.vmem [resolvable:$true] %s2381_s4 }
 0xa9b   :  { %v2352_v18 = vsel %vm3940_vm1, %v2319_v24, %v2351_v26  ;;  %v2339_v43 = vmul.f32 %v2337_v28, %v2016_v62  ;;  %s2880_s15 = scalar_lea.vmem %s2382_s4, 128  ;;  %p2885_p9 = scmp.lt.s32.totalorder %s2382_s4, %s2382_s4 }
 0xa9c   :  { %v2353_v36 = vsel %vm3941_vm9, %v2326_v33, %v2352_v18  ;;  %p2881_p8 = scmp.ne.s32.totalorder %s2382_s4, %s2880_s15  ;;  %p2886_p10 = scmp.lt.s32.totalorder %s2880_s15, %s2880_s15 }
 0xa9d   :  { %v2354_v1 = vsel %vm3942_vm10, %v2333_v35, %v2353_v36 }
 0xa9e   :  { %v2356_v5 = vadd.f32 %v2354_v1, %v2339_v43  ;;  %p2887_p11 = por %p2886_p10, %p2885_p9 }
 0xaa0   :  { %2357 = vst [vmem:[#allocation2] sm:$0xff] %v2356_v5  ;;  %p2888_p12 = pnand %p2887_p11, %p2881_p8 }
 0xaa2   :  { %2891 = shalt.err (!%p2888_p12)
}
 0xaa3   :  { %s2892_s27 = scalar_lea.hbm %s3935_s14, 128 }
 0xaa4   :  { %p2893_p13 = scmp.ne.s32.totalorder %s3935_s14, %s2892_s27  ;;  %p2896_p0 = scmp.lt.u32.totalorder %s2892_s27, %s3935_s14 }
 0xaa6   :  { %p2898_p1 = pnand %p2896_p0, %p2893_p13 }
 0xaa8   :  { %2901 = shalt.err (!%p2898_p1)
}
 0xaa9   :  { %2384 = dma.vmem_to_hbm [thread:$0]  %s2382_s4, 128, %s3935_s14, [#allocation3]  }
 0xaaa   :  { %2902 = dma.done.wait [#allocation3], 128  }
 0xaab   :  { %2903 = vsyncadd [#allocation3], 4294967168 }
 0xaac   :  { %2904 = dma.done.wait [#allocation5], 128  }
 0xaad   :  { %2905 = vsyncadd [#allocation5], 4294967168 }
 0xaae   :  { %2401 = vsyncpa [#allocation3], 1 }
 0xaaf   :  { %2402 = vsyncpa [#allocation5], 1 }

</bundles_post_ra>
